<compile_context>
chip_gen: v7x
topology: tpu7x:2x2x1
jax: 0.10.0
libtpu: 0.0.40
codegen_flags: <defaults>
</compile_context>

<pallas_src>
import numpy as np
import jax
import jax.numpy as jnp
from jax.experimental import pallas as pl
from jax.experimental.pallas import tpu as pltpu


def _nearest_indices(in_size: int, out_size: int) -> np.ndarray:
    # PyTorch F.interpolate(mode='nearest'): src = floor(dst * in/out).
    idx = (np.arange(out_size) * in_size) // out_size
    return np.minimum(idx, in_size - 1).astype(np.int64)


def _h_runs(h_idx: np.ndarray):
    """Run-length encode the (non-decreasing) nearest source rows."""
    runs = []
    for r in h_idx:
        r = int(r)
        if runs and runs[-1][0] == r:
            runs[-1][1] += 1
        else:
            runs.append([r, 1])
    return [(r, c) for r, c in runs]


def _make_cbfuse_kernel(src_meta, tgt_h, tgt_w):
    """Kernel arg order: x_0..x_{k-1}, target, out."""
    num_src = len(src_meta)

    def kernel(*refs):
        x_refs = refs[:num_src]
        tgt_ref = refs[num_src]
        out_ref = refs[num_src + 1]

        acc = tgt_ref[0].astype(jnp.float32)            # (Ht, Wt, c)

        for meta, x_ref in zip(src_meta, x_refs):
            x = x_ref[0]                                 # (Hi, Wi, c)
            hi, wi, c = x.shape

            # ---- W nearest-resize (sublane dim) --------------------------
            if wi == tgt_w:                              # identity
                xw = x.astype(jnp.float32)
            else:
                # One-hot selection matrix built from iota (no DMA'd operand,
                # no integer division): sel[t, s] = 1 iff s == floor(t*wi/Wt).
                row = jax.lax.broadcasted_iota(jnp.int32, (tgt_w, wi), 0)
                col = jax.lax.broadcasted_iota(jnp.int32, (tgt_w, wi), 1)
                sel = ((col * tgt_w <= row * wi)
                       & (row * wi < (col + 1) * tgt_w)).astype(x.dtype)
                selb = jnp.broadcast_to(sel[None], (hi, tgt_w, wi))
                # Batched over Hi: (Wt, Wi) @ (Wi, c) -> (Wt, c); lanes = c
                # (dense).  HIGHEST precision + f32 accumulation keeps the
                # one-hot selection bit-exact for f32 inputs.
                xw = jax.lax.dot_general(
                    selb, x,
                    dimension_numbers=(((2,), (1,)), ((0,), (0,))),
                    precision=jax.lax.Precision.HIGHEST,
                    preferred_element_type=jnp.float32)  # (Hi, Wt, c) f32

            # ---- H nearest-resize (leading, untiled dim -> cheap) --------
            if meta["h_mode"] == "identity":
                xh = xw
            elif meta["h_mode"] == "repeat":
                f = meta["h_factor"]
                xh = jnp.broadcast_to(
                    xw[:, None], (hi, f, tgt_w, c)).reshape(hi * f, tgt_w, c)
            else:  # run-length grouped static gather on the leading dim
                pieces = []
                for srow, cnt in meta["h_runs"]:
                    piece = xw[srow][None]               # (1, Wt, c)
                    if cnt > 1:
                        piece = jnp.broadcast_to(piece, (cnt, tgt_w, c))
                    pieces.append(piece)
                xh = jnp.concatenate(pieces, axis=0)     # (Ht, Wt, c)

            acc = acc + xh

        out_ref[0] = acc.astype(out_ref.dtype)

    return kernel


def cbfuse_nhwc(picked_nhwc, target_nhwc):
    """Channels-last core: picked_nhwc is a list of (N, Hi, Wi, C) sources,
    target_nhwc is (N, Ht, Wt, C).  Returns the fused (N, Ht, Wt, C) map."""
    N, Ht, Wt, C = target_nhwc.shape
    itemsize = np.dtype(target_nhwc.dtype).itemsize
    src_shapes = [(int(x.shape[1]), int(x.shape[2])) for x in picked_nhwc]

    # ---- Generation-aware VMEM budget ------------------------------------
    try:
        phys_vmem = int(pltpu.get_tpu_info().vmem_capacity_bytes)
    except Exception:
        phys_vmem = 64 * 2**20                 # conservative (v7x per-core)
    vmem_cap = max(32 * 2**20, min(int(0.80 * phys_vmem), 100 * 2**20))

    def step_bytes(c):
        # Double-buffered in/out blocks + reused f32 temps, ~25% headroom.
        io = 2 * Ht * Wt * c * itemsize * 2    # target in + out
        per_src_tmp = 0
        for hi, wi in src_shapes:
            io += 2 * hi * wi * c * itemsize
            per_src_tmp = max(per_src_tmp, (hi * Wt + Ht * Wt) * c * 4)
        tmp = Ht * Wt * c * 4 + per_src_tmp    # f32 accumulator + one source
        return int((io + tmp) * 1.25)

    # ---- Channel tile: largest 128-multiple divisor of C that fits VMEM,
    #      preferring >= 2 total programs (keeps both v7x TCs busy). --------
    if C % 128 == 0:
        cands = [c for c in range(C, 0, -128) if C % c == 0]
        fitting = [c for c in cands if step_bytes(c) <= vmem_cap] or [cands[-1]]
        multi = [c for c in fitting if N * (C // c) >= 2]
        c_tile = multi[0] if multi else fitting[0]
    else:
        c_tile = C   # full-dim block is exempt from the (8,128) rule

    # ---- Per-source resize metadata (all static) --------------------------
    src_meta = []
    for (hi, wi) in src_shapes:
        if hi == Ht:
            src_meta.append(dict(h_mode="identity", h_factor=None, h_runs=None))
        elif Ht % hi == 0:
            src_meta.append(dict(h_mode="repeat", h_factor=Ht // hi, h_runs=None))
        else:
            src_meta.append(dict(h_mode="runs", h_factor=None,
                                 h_runs=_h_runs(_nearest_indices(hi, Ht))))

    in_specs = [
        pl.BlockSpec((1, hi, wi, c_tile), lambda n, ci: (n, 0, 0, ci))
        for (hi, wi) in src_shapes
    ]
    in_specs.append(
        pl.BlockSpec((1, Ht, Wt, c_tile), lambda n, ci: (n, 0, 0, ci)))
    out_spec = pl.BlockSpec((1, Ht, Wt, c_tile), lambda n, ci: (n, 0, 0, ci))

    # ---- Tell XLA this kernel is memory-bound -----------------------------
    bytes_accessed = (
        sum(int(np.prod(x.shape)) * np.dtype(x.dtype).itemsize
            for x in picked_nhwc)
        + 2 * N * Ht * Wt * C * itemsize)                 # target + output
    flops = len(picked_nhwc) * N * Ht * Wt * C            # the adds
    for (hi, wi) in src_shapes:
        if wi != Wt:
            flops += 2 * N * hi * Wt * wi * C              # one-hot dots
    cost = pl.CostEstimate(flops=flops, transcendentals=0,
                           bytes_accessed=bytes_accessed)

    kernel = _make_cbfuse_kernel(src_meta, Ht, Wt)

    return pl.pallas_call(
        kernel,
        out_shape=jax.ShapeDtypeStruct((N, Ht, Wt, C), target_nhwc.dtype),
        grid=(N, C // c_tile),
        in_specs=in_specs,
        out_specs=out_spec,
        compiler_params=pltpu.CompilerParams(
            dimension_semantics=("parallel", "parallel"),
            vmem_limit_bytes=vmem_cap),
        cost_estimate=cost,
    )(*picked_nhwc, target_nhwc)


def cbfuse(x_list, idx):
    """Mirror of CBFuse.forward (NCHW in / NCHW out, matching PyTorch).

    x_list: first len(idx) entries are *lists* of NCHW arrays (pick idx[i]),
    last entry is the NCHW target.  In an NHWC graph, call cbfuse_nhwc
    directly — these wrapper transposes are separate HBM-bound XLA ops that
    roughly double the memory traffic of this (HBM-roofline-bound) op.
    """
    target = x_list[-1]
    picked = [x[pid] for pid, x in zip(idx, x_list)]
    out_nhwc = cbfuse_nhwc(
        [jnp.transpose(x, (0, 2, 3, 1)) for x in picked],
        jnp.transpose(target, (0, 2, 3, 1)))
    return jnp.transpose(out_nhwc, (0, 3, 1, 2))


def cbfuse_ref_np(x_list, idx):
    """Pure-numpy reference of CBFuse.forward (nearest interpolate + sum)."""
    target = np.asarray(x_list[-1]).astype(np.float32)
    N, C, Ht, Wt = target.shape
    out = target.copy()
    for pid, xs in zip(idx, x_list):
        x = np.asarray(xs[pid]).astype(np.float32)
        hi = _nearest_indices(x.shape[2], Ht)
        wi = _nearest_indices(x.shape[3], Wt)
        out += x[:, :, hi[:, None], wi[None, :]]
    return out


if __name__ == "__main__":
    key = jax.random.PRNGKey(0)
    k = jax.random.split(key, 8)

    N, C, Ht, Wt = 2, 4, 16, 16
    idx = [0, 1, 0, 0]  # CBFuse(index=[0, 1, 0, 0])

    # x_list structure mirroring the module: lists of multi-scale features
    # followed by the target feature map. Covers integer upsample (2x, 4x),
    # identity-size source, and a non-integer ratio (6 -> 16).
    list_a = [jax.random.normal(k[0], (N, C, 8, 8), jnp.float32),
              jax.random.normal(k[1], (N, C, 4, 4), jnp.float32)]
    list_b = [jax.random.normal(k[2], (N, C, 16, 16), jnp.float32),
              jax.random.normal(k[3], (N, C, 4, 4), jnp.float32)]
    list_c = [jax.random.normal(k[4], (N, C, 16, 16), jnp.float32)]
    list_d = [jax.random.normal(k[5], (N, C, 6, 6), jnp.float32)]
    target = jax.random.normal(k[6], (N, C, Ht, Wt), jnp.float32)

    x_list = [list_a, list_b, list_c, list_d, target]

    out = jax.block_until_ready(cbfuse(x_list, idx))

    ref = cbfuse_ref_np(x_list, idx)
    np.testing.assert_allclose(np.asarray(out), ref, rtol=1e-5, atol=1e-5)

    print("KERNEL_OK")
</pallas_src>

<mosaic_0001>
module attributes {stable_mosaic.version = 11 : i64} {
  func.func @kernel(%arg0: i32, %arg1: i32, %arg2: memref<1x8x8x4xf32, #tpu.memory_space<vmem>>, %arg3: memref<1x4x4x4xf32, #tpu.memory_space<vmem>>, %arg4: memref<1x16x16x4xf32, #tpu.memory_space<vmem>>, %arg5: memref<1x6x6x4xf32, #tpu.memory_space<vmem>>, %arg6: memref<1x16x16x4xf32, #tpu.memory_space<vmem>>, %arg7: memref<1x16x16x4xf32, #tpu.memory_space<vmem>>) attributes {dimension_semantics = [#tpu.dimension_semantics<parallel>, #tpu.dimension_semantics<parallel>], iteration_bounds = array<i64: 2, 1>, scalar_prefetch = 0 : i64, scratch_operands = 0 : i64, tpu.core_type = #tpu.core_type<tc>, window_params = [{transform_indices = @transform_0, window_bounds = array<i64: 1, 8, 8, 4>}, {transform_indices = @transform_1, window_bounds = array<i64: 1, 4, 4, 4>}, {transform_indices = @transform_2, window_bounds = array<i64: 1, 16, 16, 4>}, {transform_indices = @transform_3, window_bounds = array<i64: 1, 6, 6, 4>}, {transform_indices = @transform_4, window_bounds = array<i64: 1, 16, 16, 4>}, {transform_indices = @transform_5, window_bounds = array<i64: 1, 16, 16, 4>}]} {
    %c0 = arith.constant 0 : index
    %c0_0 = arith.constant 0 : index
    %c0_1 = arith.constant 0 : index
    %c0_2 = arith.constant 0 : index
    %0 = vector.load %arg6[%c0, %c0_0, %c0_1, %c0_2] : memref<1x16x16x4xf32, #tpu.memory_space<vmem>>, vector<1x16x16x4xf32>
    %1 = vector.shape_cast %0 : vector<1x16x16x4xf32> to vector<16x16x4xf32>
    %c0_3 = arith.constant 0 : index
    %c0_4 = arith.constant 0 : index
    %c0_5 = arith.constant 0 : index
    %c0_6 = arith.constant 0 : index
    %2 = vector.load %arg2[%c0_3, %c0_4, %c0_5, %c0_6] : memref<1x8x8x4xf32, #tpu.memory_space<vmem>>, vector<1x8x8x4xf32>
    %3 = vector.shape_cast %2 : vector<1x8x8x4xf32> to vector<8x8x4xf32>
    %4 = tpu.iota {dimensions = array<i32: 0>} : vector<16x8xi32>
    %5 = tpu.iota {dimensions = array<i32: 1>} : vector<16x8xi32>
    %c16_i32 = arith.constant 16 : i32
    %6 = vector.broadcast %c16_i32 : i32 to vector<16x8xi32>
    %7 = arith.muli %5, %6 : vector<16x8xi32>
    %c8_i32 = arith.constant 8 : i32
    %8 = vector.broadcast %c8_i32 : i32 to vector<16x8xi32>
    %9 = arith.muli %4, %8 : vector<16x8xi32>
    %10 = arith.cmpi sle, %7, %9 : vector<16x8xi32>
    %c8_i32_7 = arith.constant 8 : i32
    %11 = vector.broadcast %c8_i32_7 : i32 to vector<16x8xi32>
    %12 = arith.muli %4, %11 : vector<16x8xi32>
    %c1_i32 = arith.constant 1 : i32
    %13 = vector.broadcast %c1_i32 : i32 to vector<16x8xi32>
    %14 = arith.addi %5, %13 : vector<16x8xi32>
    %c16_i32_8 = arith.constant 16 : i32
    %15 = vector.broadcast %c16_i32_8 : i32 to vector<16x8xi32>
    %16 = arith.muli %14, %15 : vector<16x8xi32>
    %17 = arith.cmpi slt, %12, %16 : vector<16x8xi32>
    %18 = arith.andi %10, %17 : vector<16x8xi1>
    %19 = arith.extui %18 : vector<16x8xi1> to vector<16x8xi32>
    %20 = arith.sitofp %19 : vector<16x8xi32> to vector<16x8xf32>
    %21 = vector.shape_cast %20 : vector<16x8xf32> to vector<1x16x8xf32>
    %22 = vector.shape_cast %21 : vector<1x16x8xf32> to vector<1x16x8xf32>
    %23 = vector.broadcast %22 : vector<1x16x8xf32> to vector<8x16x8xf32>
    %cst = arith.constant dense<0.000000e+00> : vector<8x16x4xf32>
    %24 = tpu.matmul %23, %3, %cst {dimension_numbers = #tpu.dot_dimension_numbers<[2], [1], [1], [2], [0, 0, 0, 1, 1, 2], [0], [0]>, precision = #tpu.contract_precision<fp32>} : vector<8x16x8xf32>, vector<8x8x4xf32>, vector<8x16x4xf32> -> vector<8x16x4xf32>
    %25 = vector.shape_cast %24 : vector<8x16x4xf32> to vector<8x1x16x4xf32>
    %26 = vector.shape_cast %25 : vector<8x1x16x4xf32> to vector<8x1x16x4xf32>
    %27 = vector.broadcast %26 : vector<8x1x16x4xf32> to vector<8x2x16x4xf32>
    %28 = vector.shape_cast %27 : vector<8x2x16x4xf32> to vector<16x16x4xf32>
    %29 = arith.addf %1, %28 : vector<16x16x4xf32>
    %c0_9 = arith.constant 0 : index
    %c0_10 = arith.constant 0 : index
    %c0_11 = arith.constant 0 : index
    %c0_12 = arith.constant 0 : index
    %30 = vector.load %arg3[%c0_9, %c0_10, %c0_11, %c0_12] : memref<1x4x4x4xf32, #tpu.memory_space<vmem>>, vector<1x4x4x4xf32>
    %31 = vector.shape_cast %30 : vector<1x4x4x4xf32> to vector<4x4x4xf32>
    %32 = tpu.iota {dimensions = array<i32: 0>} : vector<16x4xi32>
    %33 = tpu.iota {dimensions = array<i32: 1>} : vector<16x4xi32>
    %c16_i32_13 = arith.constant 16 : i32
    %34 = vector.broadcast %c16_i32_13 : i32 to vector<16x4xi32>
    %35 = arith.muli %33, %34 : vector<16x4xi32>
    %c4_i32 = arith.constant 4 : i32
    %36 = vector.broadcast %c4_i32 : i32 to vector<16x4xi32>
    %37 = arith.muli %32, %36 : vector<16x4xi32>
    %38 = arith.cmpi sle, %35, %37 : vector<16x4xi32>
    %c4_i32_14 = arith.constant 4 : i32
    %39 = vector.broadcast %c4_i32_14 : i32 to vector<16x4xi32>
    %40 = arith.muli %32, %39 : vector<16x4xi32>
    %c1_i32_15 = arith.constant 1 : i32
    %41 = vector.broadcast %c1_i32_15 : i32 to vector<16x4xi32>
    %42 = arith.addi %33, %41 : vector<16x4xi32>
    %c16_i32_16 = arith.constant 16 : i32
    %43 = vector.broadcast %c16_i32_16 : i32 to vector<16x4xi32>
    %44 = arith.muli %42, %43 : vector<16x4xi32>
    %45 = arith.cmpi slt, %40, %44 : vector<16x4xi32>
    %46 = arith.andi %38, %45 : vector<16x4xi1>
    %47 = arith.extui %46 : vector<16x4xi1> to vector<16x4xi32>
    %48 = arith.sitofp %47 : vector<16x4xi32> to vector<16x4xf32>
    %49 = vector.shape_cast %48 : vector<16x4xf32> to vector<1x16x4xf32>
    %50 = vector.shape_cast %49 : vector<1x16x4xf32> to vector<1x16x4xf32>
    %51 = vector.broadcast %50 : vector<1x16x4xf32> to vector<4x16x4xf32>
    %cst_17 = arith.constant dense<0.000000e+00> : vector<4x16x4xf32>
    %52 = tpu.matmul %51, %31, %cst_17 {dimension_numbers = #tpu.dot_dimension_numbers<[2], [1], [1], [2], [0, 0, 0, 1, 1, 2], [0], [0]>, precision = #tpu.contract_precision<fp32>} : vector<4x16x4xf32>, vector<4x4x4xf32>, vector<4x16x4xf32> -> vector<4x16x4xf32>
    %53 = vector.shape_cast %52 : vector<4x16x4xf32> to vector<4x1x16x4xf32>
    %54 = vector.shape_cast %53 : vector<4x1x16x4xf32> to vector<4x1x16x4xf32>
    %55 = vector.broadcast %54 : vector<4x1x16x4xf32> to vector<4x4x16x4xf32>
    %56 = vector.shape_cast %55 : vector<4x4x16x4xf32> to vector<16x16x4xf32>
    %57 = arith.addf %29, %56 : vector<16x16x4xf32>
    %c0_18 = arith.constant 0 : index
    %c0_19 = arith.constant 0 : index
    %c0_20 = arith.constant 0 : index
    %c0_21 = arith.constant 0 : index
    %58 = vector.load %arg4[%c0_18, %c0_19, %c0_20, %c0_21] : memref<1x16x16x4xf32, #tpu.memory_space<vmem>>, vector<1x16x16x4xf32>
    %59 = vector.shape_cast %58 : vector<1x16x16x4xf32> to vector<16x16x4xf32>
    %60 = arith.addf %57, %59 : vector<16x16x4xf32>
    %c0_22 = arith.constant 0 : index
    %c0_23 = arith.constant 0 : index
    %c0_24 = arith.constant 0 : index
    %c0_25 = arith.constant 0 : index
    %61 = vector.load %arg5[%c0_22, %c0_23, %c0_24, %c0_25] : memref<1x6x6x4xf32, #tpu.memory_space<vmem>>, vector<1x6x6x4xf32>
    %62 = vector.shape_cast %61 : vector<1x6x6x4xf32> to vector<6x6x4xf32>
    %63 = tpu.iota {dimensions = array<i32: 0>} : vector<16x6xi32>
    %64 = tpu.iota {dimensions = array<i32: 1>} : vector<16x6xi32>
    %c16_i32_26 = arith.constant 16 : i32
    %65 = vector.broadcast %c16_i32_26 : i32 to vector<16x6xi32>
    %66 = arith.muli %64, %65 : vector<16x6xi32>
    %c6_i32 = arith.constant 6 : i32
    %67 = vector.broadcast %c6_i32 : i32 to vector<16x6xi32>
    %68 = arith.muli %63, %67 : vector<16x6xi32>
    %69 = arith.cmpi sle, %66, %68 : vector<16x6xi32>
    %c6_i32_27 = arith.constant 6 : i32
    %70 = vector.broadcast %c6_i32_27 : i32 to vector<16x6xi32>
    %71 = arith.muli %63, %70 : vector<16x6xi32>
    %c1_i32_28 = arith.constant 1 : i32
    %72 = vector.broadcast %c1_i32_28 : i32 to vector<16x6xi32>
    %73 = arith.addi %64, %72 : vector<16x6xi32>
    %c16_i32_29 = arith.constant 16 : i32
    %74 = vector.broadcast %c16_i32_29 : i32 to vector<16x6xi32>
    %75 = arith.muli %73, %74 : vector<16x6xi32>
    %76 = arith.cmpi slt, %71, %75 : vector<16x6xi32>
    %77 = arith.andi %69, %76 : vector<16x6xi1>
    %78 = arith.extui %77 : vector<16x6xi1> to vector<16x6xi32>
    %79 = arith.sitofp %78 : vector<16x6xi32> to vector<16x6xf32>
    %80 = vector.shape_cast %79 : vector<16x6xf32> to vector<1x16x6xf32>
    %81 = vector.shape_cast %80 : vector<1x16x6xf32> to vector<1x16x6xf32>
    %82 = vector.broadcast %81 : vector<1x16x6xf32> to vector<6x16x6xf32>
    %cst_30 = arith.constant dense<0.000000e+00> : vector<6x16x4xf32>
    %83 = tpu.matmul %82, %62, %cst_30 {dimension_numbers = #tpu.dot_dimension_numbers<[2], [1], [1], [2], [0, 0, 0, 1, 1, 2], [0], [0]>, precision = #tpu.contract_precision<fp32>} : vector<6x16x6xf32>, vector<6x6x4xf32>, vector<6x16x4xf32> -> vector<6x16x4xf32>
    %84 = vector.extract_strided_slice %83 {offsets = [0, 0, 0], sizes = [1, 16, 4], strides = [1, 1, 1]} : vector<6x16x4xf32> to vector<1x16x4xf32>
    %85 = vector.shape_cast %84 : vector<1x16x4xf32> to vector<16x4xf32>
    %86 = vector.shape_cast %85 : vector<16x4xf32> to vector<1x16x4xf32>
    %87 = vector.shape_cast %86 : vector<1x16x4xf32> to vector<1x16x4xf32>
    %88 = vector.broadcast %87 : vector<1x16x4xf32> to vector<3x16x4xf32>
    %89 = vector.extract_strided_slice %83 {offsets = [1, 0, 0], sizes = [1, 16, 4], strides = [1, 1, 1]} : vector<6x16x4xf32> to vector<1x16x4xf32>
    %90 = vector.shape_cast %89 : vector<1x16x4xf32> to vector<16x4xf32>
    %91 = vector.shape_cast %90 : vector<16x4xf32> to vector<1x16x4xf32>
    %92 = vector.shape_cast %91 : vector<1x16x4xf32> to vector<1x16x4xf32>
    %93 = vector.broadcast %92 : vector<1x16x4xf32> to vector<3x16x4xf32>
    %94 = vector.extract_strided_slice %83 {offsets = [2, 0, 0], sizes = [1, 16, 4], strides = [1, 1, 1]} : vector<6x16x4xf32> to vector<1x16x4xf32>
    %95 = vector.shape_cast %94 : vector<1x16x4xf32> to vector<16x4xf32>
    %96 = vector.shape_cast %95 : vector<16x4xf32> to vector<1x16x4xf32>
    %97 = vector.shape_cast %96 : vector<1x16x4xf32> to vector<1x16x4xf32>
    %98 = vector.broadcast %97 : vector<1x16x4xf32> to vector<2x16x4xf32>
    %99 = vector.extract_strided_slice %83 {offsets = [3, 0, 0], sizes = [1, 16, 4], strides = [1, 1, 1]} : vector<6x16x4xf32> to vector<1x16x4xf32>
    %100 = vector.shape_cast %99 : vector<1x16x4xf32> to vector<16x4xf32>
    %101 = vector.shape_cast %100 : vector<16x4xf32> to vector<1x16x4xf32>
    %102 = vector.shape_cast %101 : vector<1x16x4xf32> to vector<1x16x4xf32>
    %103 = vector.broadcast %102 : vector<1x16x4xf32> to vector<3x16x4xf32>
    %104 = vector.extract_strided_slice %83 {offsets = [4, 0, 0], sizes = [1, 16, 4], strides = [1, 1, 1]} : vector<6x16x4xf32> to vector<1x16x4xf32>
    %105 = vector.shape_cast %104 : vector<1x16x4xf32> to vector<16x4xf32>
    %106 = vector.shape_cast %105 : vector<16x4xf32> to vector<1x16x4xf32>
    %107 = vector.shape_cast %106 : vector<1x16x4xf32> to vector<1x16x4xf32>
    %108 = vector.broadcast %107 : vector<1x16x4xf32> to vector<3x16x4xf32>
    %109 = vector.extract_strided_slice %83 {offsets = [5, 0, 0], sizes = [1, 16, 4], strides = [1, 1, 1]} : vector<6x16x4xf32> to vector<1x16x4xf32>
    %110 = vector.shape_cast %109 : vector<1x16x4xf32> to vector<16x4xf32>
    %111 = vector.shape_cast %110 : vector<16x4xf32> to vector<1x16x4xf32>
    %112 = vector.shape_cast %111 : vector<1x16x4xf32> to vector<1x16x4xf32>
    %113 = vector.broadcast %112 : vector<1x16x4xf32> to vector<2x16x4xf32>
    %114 = tpu.concatenate %88, %93, %98, %103, %108, %113 in 0 : vector<3x16x4xf32>, vector<3x16x4xf32>, vector<2x16x4xf32>, vector<3x16x4xf32>, vector<3x16x4xf32>, vector<2x16x4xf32> -> vector<16x16x4xf32>
    %115 = arith.addf %60, %114 : vector<16x16x4xf32>
    %c0_31 = arith.constant 0 : index
    %c0_32 = arith.constant 0 : index
    %c0_33 = arith.constant 0 : index
    %c0_34 = arith.constant 0 : index
    %116 = vector.load %arg7[%c0_31, %c0_32, %c0_33, %c0_34] : memref<1x16x16x4xf32, #tpu.memory_space<vmem>>, vector<1x16x16x4xf32>
    %117 = vector.shape_cast %116 : vector<1x16x16x4xf32> to vector<16x16x4xf32>
    %118 = vector.shape_cast %115 : vector<16x16x4xf32> to vector<1x16x16x4xf32>
    tpu.vector_store %arg7[%c0_31, %c0_32, %c0_33, %c0_34], %118 {strides = array<i32>} : memref<1x16x16x4xf32, #tpu.memory_space<vmem>>, vector<1x16x16x4xf32>,
    return
  }
  func.func @transform_0(%arg0: i32, %arg1: i32) -> (i32, i32, i32, i32) {
    %c0_i32 = arith.constant 0 : i32
    %c0_i32_0 = arith.constant 0 : i32
    %c0_i32_1 = arith.constant 0 : i32
    return %arg0, %c0_i32, %c0_i32_0, %arg1 : i32, i32, i32, i32
  }
  func.func @transform_1(%arg0: i32, %arg1: i32) -> (i32, i32, i32, i32) {
    %c0_i32 = arith.constant 0 : i32
    %c0_i32_0 = arith.constant 0 : i32
    %c0_i32_1 = arith.constant 0 : i32
    return %arg0, %c0_i32, %c0_i32_0, %arg1 : i32, i32, i32, i32
  }
  func.func @transform_2(%arg0: i32, %arg1: i32) -> (i32, i32, i32, i32) {
    %c0_i32 = arith.constant 0 : i32
    %c0_i32_0 = arith.constant 0 : i32
    %c0_i32_1 = arith.constant 0 : i32
    return %arg0, %c0_i32, %c0_i32_0, %arg1 : i32, i32, i32, i32
  }
  func.func @transform_3(%arg0: i32, %arg1: i32) -> (i32, i32, i32, i32) {
    %c0_i32 = arith.constant 0 : i32
    %c0_i32_0 = arith.constant 0 : i32
    %c0_i32_1 = arith.constant 0 : i32
    return %arg0, %c0_i32, %c0_i32_0, %arg1 : i32, i32, i32, i32
  }
  func.func @transform_4(%arg0: i32, %arg1: i32) -> (i32, i32, i32, i32) {
    %c0_i32 = arith.constant 0 : i32
    %c0_i32_0 = arith.constant 0 : i32
    %c0_i32_1 = arith.constant 0 : i32
    return %arg0, %c0_i32, %c0_i32_0, %arg1 : i32, i32, i32, i32
  }
  func.func @transform_5(%arg0: i32, %arg1: i32) -> (i32, i32, i32, i32) {
    %c0_i32 = arith.constant 0 : i32
    %c0_i32_0 = arith.constant 0 : i32
    %c0_i32_1 = arith.constant 0 : i32
    return %arg0, %c0_i32, %c0_i32_0, %arg1 : i32, i32, i32, i32
  }
}

</mosaic_0001>

<bundles_post_ra>
// kernel: tpu_custom_call.1
= control target key start
LH: loop header
LB: loop body
LE: loop exit
PB: predicated region body
PF: predicated region fallthrough
CT: control target
= control target key end

     0   :  { %s10938_s18 = smov 0   ;;  %s10940_s19 = smov 0   ;;  %s11999_s0 = inlined_call_operand.vmem [shape: f32[2,8,8,4], index: 0, kind: input, shape index: {}]   ;;  %s12000_s1 = inlined_call_operand.vmem [shape: f32[2,4,4,4], index: 1, kind: input, shape index: {}]   ;;  %s12001_s2 = inlined_call_operand.vmem [shape: f32[2,16,16,4], index: 2, kind: input, shape index: {}]   ;;  %s12002_s3 = inlined_call_operand.vmem [shape: f32[2,6,6,4], index: 3, kind: input, shape index: {}]   ;;  %s12003_s4 = inlined_call_operand.vmem [shape: f32[2,16,16,4], index: 4, kind: input, shape index: {}]   ;;  %s12004_s5 = inlined_call_operand.vmem [shape: f32[2,16,16,4], index: 5, kind: output, shape index: {}]  }
   0x1   :  { %s10942_s20 = smov 0  }
   0x2 LB: > { %s27_s21 = sadd.s32 1, %s10901_s19  ;;  %p9680_p0 = scmp.ge.s32.totalorder %s10905_s20, 1  ;;  %s10905_s20 = sphi %s10942_s20, %s15_s20   ;;  %s10901_s19 = sphi %s10940_s19, %s12026_s19   ;;  %s10897_s18 = sphi %s10938_s18, %s12025_s18  }
   0x3   : > { %p29_p1 = scmp.ge.s32.totalorder %s27_s21, 2  ;;  %p266_p2 = scmp.lt.s32.totalorder %s10905_s20, 3 }
   0x5   : > { %s12028_s21 = smov (%p29_p1, %s27_s21), 0  ;;  %p267_p3 = pnand %p9680_p0, %p266_p2 }
   0x6   : > { %p332_p4 = scmp.lt.s32.totalorder (!%p267_p3), %s10897_s18, 1  ;;  %v420_v0 = vlaneseq (!%p267_p3)  ;;  %vm440_vm2 = vcmask (!%p267_p3), 64512   ;;  %v10907_v17 = vmov (!%p267_p3), 0.0   ;;  %vm4414_vm9 = vcmask (!%p267_p3), 1043456  }
   0x7   : > { %270 = sbr.rel (%p267_p3) target bundleno = 638 (0x27e), region = 40  ;;  %vm4407_vm14 = vcmask (!%p267_p3), 31744  }
   0x8   : > { %v10958_v1 = vshrl.u32 (!%p267_p3), %v420_v0, 7  ;;  %v424_v2 = vand.u32 (!%p267_p3), 127, %v420_v0 }
   0xa   : > { %v10961_v3 = vmul.u32 (!%p267_p3), 16, %v424_v2  ;;  %v426_v4 = vmul.u32 (!%p267_p3), 8, %v10958_v1  ;;  %v430_v5 = vadd.s32 (!%p267_p3), 1, %v424_v2  ;;  %v10965_v6 = vadd.s32 (!%p267_p3), 8, %v10958_v1 }
   0xc   : > { %vm10975_vm0 = vcmp.le.s32.totalorder (!%p267_p3), %v10961_v3, %v426_v4  ;;  %v10979_v10 = vmul.u32 (!%p267_p3), 16, %v430_v5  ;;  %v427_v11 = vmul.u32 (!%p267_p3), 8, %v10965_v6 }
   0xe   : > { %s12030_s18 = smov (!%p332_p4, %s10897_s18), 1  ;;  %vm432_vm1 = vcmp.lt.s32.totalorder %v426_v4, %v10979_v10  ;;  %vm10988_vm3 = vcmp.le.s32.totalorder %v10961_v3, %v427_v11  ;;  %vm433_vm4 = vcmp.lt.s32.totalorder %v427_v11, %v10979_v10 }
   0xf   : > { %s9808_s22 = sshll.u32 %s12030_s18, 6  ;;  %vm434_vm5 = vmand %vm10975_vm0, %vm432_vm1  ;;  %s9809_s26 = sshll.u32 %s12030_s18, 4  ;;  %vm6504_vm1 = vcmask 1045504  }
  0x10   : > { %s10970_s25 = scalar_lea.vmem %s11999_s0, %s9808_s22  ;;  %v11002_v18 = vsel %vm434_vm5, 1.0, %v10907_v17  ;;  %vm435_vm6 = vmand %vm10988_vm3, %vm433_vm4  ;;  %s11227_s29 = scalar_lea.vmem %s12000_s1, %s9809_s26  ;;  %vm6497_vm5 = vcmask 48128  }
  0x11   : > { %v412_v7 = vld [vmem:[%s10970_s25] sm:$0xff]  ;;  %v413_v8 = vld [vmem:[%s10970_s25 + $0x8] sm:$0xff]  ;;  %v442_v19 = vsel %vm440_vm2, %v11002_v18, 0  ;;  %v11009_v22 = vsel %vm435_vm6, 1.0, %v10907_v17  ;;  %v414_v36 = vld [vmem:[%s10970_s25 + $0x10] sm:$0xff]  ;;  %s10857_s30 = smul.u32 48, %s12030_s18 }
  0x12   : > { %v10982_v12 = vand.u32 4294901760, %v412_v7  ;;  %v10984_v13 = vand.u32 4294901760, %v413_v8  ;;  %v11011_v23 = vsub.f32 %v442_v19, %v442_v19  ;;  %v445_v24 = vsel %vm440_vm2, %v11009_v22, 0  ;;  %v415_v37 = vld [vmem:[%s10970_s25 + $0x18] sm:$0xff]  ;;  %v416_v48 = vld [vmem:[%s10970_s25 + $0x20] sm:$0xff]  ;;  %v417_v49 = vld [vmem:[%s10970_s25 + $0x28] sm:$0xff] }
  0x13   : > { %v11015_v27 = vsub.f32 %v445_v24, %v445_v24  ;;  %v11055_v38 = vand.u32 4294901760, %v414_v36  ;;  %v11057_v39 = vand.u32 4294901760, %v415_v37  ;;  %v11111_v50 = vand.u32 4294901760, %v416_v48  ;;  %v418_v60 = vld [vmem:[%s10970_s25 + $0x30] sm:$0xff]  ;;  %v419_v61 = vld [vmem:[%s10970_s25 + $0x38] sm:$0xff]  ;;  %s11417_s8 = scalar_lea.vmem %s12002_s3, %s10857_s30  ;;  %s11714_s9 = sshll.u32 %s12030_s18, 8 }
  0x14   : > { %10137 = vmatprep.subr.mxu0 %v10982_v12  ;;  %10167 = vmatprep.subr.mxu1 %v10984_v13  ;;  %v535_v15 = vsub.f32 %v412_v7, %v10982_v12  ;;  %v1024_v16 = vsub.f32 %v413_v8, %v10984_v13  ;;  %v11018_v28 = vand.u32 4294901760, %v11011_v23  ;;  %v11113_v51 = vand.u32 4294901760, %v417_v49  ;;  %s11720_s12 = scalar_lea.vmem %s12003_s4, %s11714_s9  ;;  %s11813_s15 = scalar_lea.vmem %s12001_s2, %s11714_s9 }
  0x15   : > { %10138 = vmatpush3.msra.mxu0 %v10982_v12  ;;  %10168 = vmatpush3.msra.mxu1 %v10984_v13  ;;  %v11021_v31 = vand.u32 4294901760, %v11015_v27  ;;  %v1513_v40 = vsub.f32 %v414_v36, %v11055_v38  ;;  %v2002_v41 = vsub.f32 %v415_v37, %v11057_v39  ;;  %v2491_v52 = vsub.f32 %v416_v48, %v11111_v50  ;;  %s11888_s18 = scalar_lea.vmem %s12004_s5, %s11714_s9 }
  0x16   : > { %v536_v20 = vand.u32 4294901760, %v535_v15  ;;  %v1025_v21 = vand.u32 4294901760, %v1024_v16  ;;  %v516_v32 = vsub.f32 %v11011_v23, %v11018_v28  ;;  %v2980_v53 = vsub.f32 %v417_v49, %v11113_v51 }
  0x17   : > { %v526_v33 = vsub.f32 %v11015_v27, %v11021_v31  ;;  %v1514_v42 = vand.u32 4294901760, %v1513_v40  ;;  %v2003_v43 = vand.u32 4294901760, %v2002_v41  ;;  %v2492_v54 = vand.u32 4294901760, %v2491_v52 }
  0x18   : > { %v537_v25 = vsub.f32 %v535_v15, %v536_v20  ;;  %v1026_v26 = vsub.f32 %v1024_v16, %v1025_v21  ;;  %v11027_v34 = vand.u32 4294901760, %v516_v32  ;;  %v2981_v55 = vand.u32 4294901760, %v2980_v53 }
  0x19   : > { %v11029_v35 = vand.u32 4294901760, %v526_v33  ;;  %v1515_v44 = vsub.f32 %v1513_v40, %v1514_v42  ;;  %v2004_v45 = vsub.f32 %v2002_v41, %v2003_v43  ;;  %v2493_v56 = vsub.f32 %v2491_v52, %v2492_v54 }
  0x1a   : > { %v538_v29 = vand.u32 4294901760, %v537_v25  ;;  %v1027_v30 = vand.u32 4294901760, %v1026_v26  ;;  %10139 = vmatprep.mubr.f32.mxu0 %v11027_v34  ;;  %10169 = vmatprep.mubr.f32.mxu1 %v11027_v34  ;;  %v2982_v57 = vsub.f32 %v2980_v53, %v2981_v55  ;;  %v11167_v62 = vand.u32 4294901760, %v418_v60 }
  0x1b   : > { %10140 = vmatmul.mubr.f32.vlgmr.msra.gmra.mrb[0].mxu0 %v11029_v35  ;;  %10170 = vmatmul.mubr.f32.vlgmr.msra.gmra.mrb[0].mxu1 %v11029_v35  ;;  %v1516_v46 = vand.u32 4294901760, %v1515_v44  ;;  %v2005_v47 = vand.u32 4294901760, %v2004_v45  ;;  %v2494_v58 = vand.u32 4294901760, %v2493_v56  ;;  %v11169_v63 = vand.u32 4294901760, %v419_v61 }
  0x1c   : > { %10142 = vmatprep.subr.mxu0 %v538_v29  ;;  %10172 = vmatprep.subr.mxu1 %v1027_v30  ;;  %v2983_v59 = vand.u32 4294901760, %v2982_v57  ;;  %v3469_v0 = vsub.f32 %v418_v60, %v11167_v62  ;;  %v6486_v60 = vmul.u32 6, %v10965_v6 }
  0x1d   : > { %10143 = vmatpush3.msra.mxu0 %v538_v29  ;;  %10173 = vmatpush3.msra.mxu1 %v1027_v30  ;;  %v3958_v2 = vsub.f32 %v419_v61, %v11169_v63 }
  0x1e   : > { %10144 = vmatprep.mubr.msk.f32.mxu0 %vm440_vm2, %v11002_v18  ;;  %10147 = vmatprep.subr.mxu0 %v535_v15  ;;  %v11181_v4 = vand.u32 4294901760, %v3469_v0  ;;  %vm11437_vm3 = vcmp.le.s32.totalorder %v10961_v3, %v6486_v60  ;;  %vm11442_vm4 = vcmp.lt.s32.totalorder %v6486_v60, %v10979_v10 }
  0x1f   : > { %10174 = vmatprep.mubr.msk.f32.mxu1 %vm440_vm2, %v11002_v18  ;;  %10177 = vmatprep.subr.mxu1 %v1024_v16  ;;  %v11183_v5 = vand.u32 4294901760, %v3958_v2  ;;  %vm6492_vm6 = vmand %vm11437_vm3, %vm11442_vm4 }
  0x20   : > { %v3471_v7 = vsub.f32 %v3469_v0, %v11181_v4 }
  0x21   : > { %v3960_v8 = vsub.f32 %v3958_v2, %v11183_v5 }
  0x22   : > { %v3472_v9 = vand.u32 4294901760, %v3471_v7  ;;  %v11467_v7 = vsel %vm6492_vm6, 1.0, %v10907_v17 }
  0x23   : > { %10145 = vmatmul.mubr.msk.f32.vlgmr.msra.gmra.mrb[0].mxu0 %vm440_vm2, %v11009_v22  ;;  %10175 = vmatmul.mubr.msk.f32.vlgmr.msra.gmra.mrb[0].mxu1 %vm440_vm2, %v11009_v22  ;;  %v3961_v11 = vand.u32 4294901760, %v3960_v8 }
  0x24   : > { %10148 = vmatpush3.msra.mxu0 %v535_v15  ;;  %10178 = vmatpush3.msra.mxu1 %v1024_v16  ;;  %v4391_v16 = vld [vmem:[%s11227_s29] sm:$0xf] }
  0x25   : > { %10149 = vmatprep.mubr.f32.mxu0 %v11011_v23  ;;  %10152 = vmatprep.subr.mxu0 %v10982_v12 }
  0x26   : > { %10179 = vmatprep.mubr.f32.mxu1 %v11011_v23  ;;  %10182 = vmatprep.subr.mxu1 %v10984_v13 }
  0x2b   : > { %10150 = vmatmul.mubr.f32.vlgmr.msra.gmra.mrb[0].mxu0 %v11015_v27  ;;  %10180 = vmatmul.mubr.f32.vlgmr.msra.gmra.mrb[0].mxu1 %v11015_v27 }
  0x2c   : > { %10153 = vmatpush3.msra.mxu0 %v10982_v12  ;;  %10183 = vmatpush3.msra.mxu1 %v10984_v13 }
  0x2d   : > { %10154 = vmatprep.mubr.f32.mxu0 %v11018_v28  ;;  %10157 = vmatprep.subr.mxu0 %v536_v20 }
  0x2e   : > { %10184 = vmatprep.mubr.f32.mxu1 %v11018_v28  ;;  %10187 = vmatprep.subr.mxu1 %v1025_v21 }
  0x33   : > { %10155 = vmatmul.mubr.f32.vlgmr.msra.gmra.mrb[0].mxu0 %v11021_v31  ;;  %10185 = vmatmul.mubr.f32.vlgmr.msra.gmra.mrb[0].mxu1 %v11021_v31 }
  0x34   : > { %10158 = vmatpush3.msra.mxu0 %v536_v20  ;;  %10188 = vmatpush3.msra.mxu1 %v1025_v21  ;;  %v4392_v21 = vld [vmem:[%s11227_s29 + $0x4] sm:$0xf] }
  0x35   : > { %10159 = vmatprep.mubr.msk.f32.mxu0 %vm440_vm2, %v11002_v18  ;;  %10162 = vmatprep.subr.mxu0 %v10982_v12  ;;  %v4908_v24 = vsel %vm4414_vm9, %v4392_v21, 0 }
  0x36   : > { %10189 = vmatprep.mubr.msk.f32.mxu1 %vm440_vm2, %v11002_v18  ;;  %10192 = vmatprep.subr.mxu1 %v10984_v13 }
  0x3b   : > { %10160 = vmatmul.mubr.msk.f32.vlgmr.msra.gmra.mrb[0].mxu0 %vm440_vm2, %v11009_v22  ;;  %10190 = vmatmul.mubr.msk.f32.vlgmr.msra.gmra.mrb[0].mxu1 %vm440_vm2, %v11009_v22 }
  0x3c   : > { %10163 = vmatpush3.msra.mxu0 %v10982_v12  ;;  %10193 = vmatpush3.msra.mxu1 %v10984_v13  ;;  %v4395_v12 = vmul.u32 4, %v10958_v1  ;;  %v4396_v13 = vmul.u32 4, %v10965_v6  ;;  %v6479_v6 = vld [vmem:[%s11417_s8] sm:$0x3f] }
  0x3d   : > { %10164 = vmatprep.mubr.msk.f32.mxu0 %vm440_vm2, %v11002_v18  ;;  %10194 = vmatprep.mubr.msk.f32.mxu1 %vm440_vm2, %v11002_v18 }
  0x3e   : > { %10197 = vmatprep.subr.mxu0 %v11055_v38  ;;  %10227 = vmatprep.subr.mxu1 %v11057_v39  ;;  %vm11230_vm7 = vcmp.le.s32.totalorder %v10961_v3, %v4395_v12  ;;  %vm11235_vm8 = vcmp.lt.s32.totalorder %v4395_v12, %v10979_v10  ;;  %vm11243_vm10 = vcmp.le.s32.totalorder %v10961_v3, %v4396_v13 }
  0x3f   : > { %vm11248_vm11 = vcmp.lt.s32.totalorder %v4396_v13, %v10979_v10  ;;  %vm4401_vm12 = vmand %vm11230_vm7, %vm11235_vm8 }
  0x40   : > { %vm4402_vm13 = vmand %vm11243_vm10, %vm11248_vm11  ;;  %v11270_v25 = vsel %vm4401_vm12, 1.0, %v10907_v17 }
  0x41   : > { %v4409_v29 = vsel %vm4407_vm14, %v11270_v25, 0 }
  0x42   : > { %v11290_v32 = vsub.f32 %v4409_v29, %v4409_v29 }
  0x43   : > { %10165 = vmatmul.mubr.msk.f32.vlgmr.msra.gmra.mrb[0].mxu0 %vm440_vm2, %v11009_v22  ;;  %10195 = vmatmul.mubr.msk.f32.vlgmr.msra.gmra.mrb[0].mxu1 %vm440_vm2, %v11009_v22 }
  0x44   : > { %10198 = vmatpush3.msra.mxu0 %v11055_v38  ;;  %10228 = vmatpush3.msra.mxu1 %v11057_v39 }
  0x45   : > { %10199 = vmatprep.mubr.f32.mxu0 %v11027_v34  ;;  %10202 = vmatprep.subr.mxu0 %v1516_v46 }
  0x46   : > { %10229 = vmatprep.mubr.f32.mxu1 %v11027_v34  ;;  %10232 = vmatprep.subr.mxu1 %v2005_v47 }
  0x47   : > { %10200 = vmatmul.mubr.f32.vlgmr.msra.gmra.mrb[2].mxu0 %v11029_v35  ;;  %10230 = vmatmul.mubr.f32.vlgmr.msra.gmra.mrb[2].mxu1 %v11029_v35 }
  0x48   : > { %10203 = vmatpush3.msra.mxu0 %v1516_v46  ;;  %10233 = vmatpush3.msra.mxu1 %v2005_v47  ;;  %v4394_v46 = vld [vmem:[%s11227_s29 + $0xc] sm:$0xf] }
  0x49   : > { %10204 = vmatprep.mubr.msk.f32.mxu0 %vm440_vm2, %v11002_v18  ;;  %10207 = vmatprep.subr.mxu0 %v1513_v40  ;;  %v5892_v48 = vsel %vm4414_vm9, %v4394_v46, 0 }
  0x4a   : > { %10234 = vmatprep.mubr.msk.f32.mxu1 %vm440_vm2, %v11002_v18  ;;  %10237 = vmatprep.subr.mxu1 %v2002_v41 }
  0x4f   : > { %10205 = vmatmul.mubr.msk.f32.vlgmr.msra.gmra.mrb[2].mxu0 %vm440_vm2, %v11009_v22  ;;  %10235 = vmatmul.mubr.msk.f32.vlgmr.msra.gmra.mrb[2].mxu1 %vm440_vm2, %v11009_v22 }
  0x50   : > { %10208 = vmatpush3.msra.mxu0 %v1513_v40  ;;  %10238 = vmatpush3.msra.mxu1 %v2002_v41 }
  0x51   : > { %10209 = vmatprep.mubr.f32.mxu0 %v11011_v23  ;;  %10212 = vmatprep.subr.mxu0 %v11055_v38 }
  0x52   : > { %10239 = vmatprep.mubr.f32.mxu1 %v11011_v23  ;;  %10242 = vmatprep.subr.mxu1 %v11057_v39 }
  0x57   : > { %10210 = vmatmul.mubr.f32.vlgmr.msra.gmra.mrb[2].mxu0 %v11015_v27  ;;  %10240 = vmatmul.mubr.f32.vlgmr.msra.gmra.mrb[2].mxu1 %v11015_v27 }
  0x58   : > { %10213 = vmatpush3.msra.mxu0 %v11055_v38  ;;  %10243 = vmatpush3.msra.mxu1 %v11057_v39 }
  0x59   : > { %10214 = vmatprep.mubr.f32.mxu0 %v11018_v28  ;;  %10217 = vmatprep.subr.mxu0 %v1514_v42 }
  0x5a   : > { %10244 = vmatprep.mubr.f32.mxu1 %v11018_v28  ;;  %10247 = vmatprep.subr.mxu1 %v2003_v43 }
  0x5f   : > { %10215 = vmatmul.mubr.f32.vlgmr.msra.gmra.mrb[2].mxu0 %v11021_v31  ;;  %10245 = vmatmul.mubr.f32.vlgmr.msra.gmra.mrb[2].mxu1 %v11021_v31 }
  0x60   : > { %10218 = vmatpush3.msra.mxu0 %v1514_v42  ;;  %10248 = vmatpush3.msra.mxu1 %v2003_v43 }
  0x61   : > { %10219 = vmatprep.mubr.msk.f32.mxu0 %vm440_vm2, %v11002_v18  ;;  %10222 = vmatprep.subr.mxu0 %v11055_v38 }
  0x62   : > { %10249 = vmatprep.mubr.msk.f32.mxu1 %vm440_vm2, %v11002_v18  ;;  %10252 = vmatprep.subr.mxu1 %v11057_v39 }
  0x67   : > { %10220 = vmatmul.mubr.msk.f32.vlgmr.msra.gmra.mrb[2].mxu0 %vm440_vm2, %v11009_v22  ;;  %10250 = vmatmul.mubr.msk.f32.vlgmr.msra.gmra.mrb[2].mxu1 %vm440_vm2, %v11009_v22 }
  0x68   : > { %10223 = vmatpush3.msra.mxu0 %v11055_v38  ;;  %10253 = vmatpush3.msra.mxu1 %v11057_v39 }
  0x69   : > { %10224 = vmatprep.mubr.msk.f32.mxu0 %vm440_vm2, %v11002_v18  ;;  %10254 = vmatprep.mubr.msk.f32.mxu1 %vm440_vm2, %v11002_v18 }
  0x6a   : > { %10257 = vmatprep.subr.mxu0 %v11111_v50  ;;  %10287 = vmatprep.subr.mxu1 %v11113_v51 }
  0x6f   : > { %10225 = vmatmul.mubr.msk.f32.vlgmr.msra.gmra.mrb[2].mxu0 %vm440_vm2, %v11009_v22  ;;  %10255 = vmatmul.mubr.msk.f32.vlgmr.msra.gmra.mrb[2].mxu1 %vm440_vm2, %v11009_v22 }
  0x70   : > { %10258 = vmatpush3.msra.mxu0 %v11111_v50  ;;  %10288 = vmatpush3.msra.mxu1 %v11113_v51 }
  0x71   : > { %10259 = vmatprep.mubr.f32.mxu0 %v11027_v34  ;;  %10262 = vmatprep.subr.mxu0 %v2494_v58 }
  0x72   : > { %10289 = vmatprep.mubr.f32.mxu1 %v11027_v34  ;;  %10292 = vmatprep.subr.mxu1 %v2983_v59 }
  0x73   : > { %10260 = vmatmul.mubr.f32.vlgmr.msra.gmra.mrb[4].mxu0 %v11029_v35  ;;  %10290 = vmatmul.mubr.f32.vlgmr.msra.gmra.mrb[4].mxu1 %v11029_v35 }
  0x74   : > { %10263 = vmatpush3.msra.mxu0 %v2494_v58  ;;  %10293 = vmatpush3.msra.mxu1 %v2983_v59  ;;  %v6485_v59 = vmul.u32 6, %v10958_v1 }
  0x75   : > { %10264 = vmatprep.mubr.msk.f32.mxu0 %vm440_vm2, %v11002_v18  ;;  %10267 = vmatprep.subr.mxu0 %v2491_v52 }
  0x76   : > { %10294 = vmatprep.mubr.msk.f32.mxu1 %vm440_vm2, %v11002_v18  ;;  %10297 = vmatprep.subr.mxu1 %v2980_v53  ;;  %vm11420_vm15 = vcmp.le.s32.totalorder %v10961_v3, %v6485_v59  ;;  %vm11425_vm0 = vcmp.lt.s32.totalorder %v6485_v59, %v10979_v10  ;;  %v6506_v3 = vsel %vm6504_vm1, %v6479_v6, 0 }
  0x7b   : > { %10265 = vmatmul.mubr.msk.f32.vlgmr.msra.gmra.mrb[4].mxu0 %vm440_vm2, %v11009_v22  ;;  %10295 = vmatmul.mubr.msk.f32.vlgmr.msra.gmra.mrb[4].mxu1 %vm440_vm2, %v11009_v22 }
  0x7c   : > { %10268 = vmatpush3.msra.mxu0 %v2491_v52  ;;  %10298 = vmatpush3.msra.mxu1 %v2980_v53 }
  0x7d   : > { %10269 = vmatprep.mubr.f32.mxu0 %v11011_v23  ;;  %10272 = vmatprep.subr.mxu0 %v11111_v50 }
  0x7e   : > { %10299 = vmatprep.mubr.f32.mxu1 %v11011_v23  ;;  %10302 = vmatprep.subr.mxu1 %v11113_v51 }
  0x83   : > { %10270 = vmatmul.mubr.f32.vlgmr.msra.gmra.mrb[4].mxu0 %v11015_v27  ;;  %10300 = vmatmul.mubr.f32.vlgmr.msra.gmra.mrb[4].mxu1 %v11015_v27 }
  0x84   : > { %10273 = vmatpush3.msra.mxu0 %v11111_v50  ;;  %10303 = vmatpush3.msra.mxu1 %v11113_v51 }
  0x85   : > { %10274 = vmatprep.mubr.f32.mxu0 %v11018_v28  ;;  %10277 = vmatprep.subr.mxu0 %v2492_v54 }
  0x86   : > { %10304 = vmatprep.mubr.f32.mxu1 %v11018_v28  ;;  %10307 = vmatprep.subr.mxu1 %v2981_v55 }
  0x8b   : > { %10275 = vmatmul.mubr.f32.vlgmr.msra.gmra.mrb[4].mxu0 %v11021_v31  ;;  %10305 = vmatmul.mubr.f32.vlgmr.msra.gmra.mrb[4].mxu1 %v11021_v31 }
  0x8c   : > { %10278 = vmatpush3.msra.mxu0 %v2492_v54  ;;  %10308 = vmatpush3.msra.mxu1 %v2981_v55 }
  0x8d   : > { %10279 = vmatprep.mubr.msk.f32.mxu0 %vm440_vm2, %v11002_v18  ;;  %10282 = vmatprep.subr.mxu0 %v11111_v50 }
  0x8e   : > { %10309 = vmatprep.mubr.msk.f32.mxu1 %vm440_vm2, %v11002_v18  ;;  %10312 = vmatprep.subr.mxu1 %v11113_v51 }
  0x93   : > { %10280 = vmatmul.mubr.msk.f32.vlgmr.msra.gmra.mrb[4].mxu0 %vm440_vm2, %v11009_v22  ;;  %10310 = vmatmul.mubr.msk.f32.vlgmr.msra.gmra.mrb[4].mxu1 %vm440_vm2, %v11009_v22 }
  0x94   : > { %10283 = vmatpush3.msra.mxu0 %v11111_v50  ;;  %10313 = vmatpush3.msra.mxu1 %v11113_v51  ;;  %v11359_v50 = vand.u32 4294901760, %v5892_v48 }
  0x95   : > { %10284 = vmatprep.mubr.msk.f32.mxu0 %vm440_vm2, %v11002_v18  ;;  %10314 = vmatprep.mubr.msk.f32.mxu1 %vm440_vm2, %v11002_v18 }
  0x96   : > { %10317 = vmatprep.subr.mxu0 %v11167_v62  ;;  %10347 = vmatprep.subr.mxu1 %v11169_v63  ;;  %v5982_v52 = vsub.f32 %v5892_v48, %v11359_v50 }
  0x98   : > { %v11373_v54 = vand.u32 4294901760, %v5982_v52 }
  0x9a   : > { %v5984_v56 = vsub.f32 %v5982_v52, %v11373_v54 }
  0x9b   : > { %10285 = vmatmul.mubr.msk.f32.vlgmr.msra.gmra.mrb[4].mxu0 %vm440_vm2, %v11009_v22  ;;  %10315 = vmatmul.mubr.msk.f32.vlgmr.msra.gmra.mrb[4].mxu1 %vm440_vm2, %v11009_v22 }
  0x9c   : > { %10318 = vmatpush3.msra.mxu0 %v11167_v62  ;;  %10348 = vmatpush3.msra.mxu1 %v11169_v63  ;;  %v5985_v58 = vand.u32 4294901760, %v5984_v56 }
  0x9d   : > { %10319 = vmatprep.mubr.f32.mxu0 %v11027_v34  ;;  %10322 = vmatprep.subr.mxu0 %v3472_v9 }
  0x9e   : > { %10349 = vmatprep.mubr.f32.mxu1 %v11027_v34  ;;  %10352 = vmatprep.subr.mxu1 %v3961_v11 }
  0x9f   : > { %10320 = vmatmul.mubr.f32.vlgmr.msra.gmra.mrb[6].mxu0 %v11029_v35  ;;  %10350 = vmatmul.mubr.f32.vlgmr.msra.gmra.mrb[6].mxu1 %v11029_v35  ;;  %v11300_v35 = vand.u32 4294901760, %v11290_v32 }
  0xa0   : > { %10323 = vmatpush3.msra.mxu0 %v3472_v9  ;;  %10353 = vmatpush3.msra.mxu1 %v3961_v11  ;;  %v6502_v11 = vsel %vm6497_vm5, %v11467_v7, 0 }
  0xa1   : > { %10324 = vmatprep.mubr.msk.f32.mxu0 %vm440_vm2, %v11002_v18  ;;  %10327 = vmatprep.subr.mxu0 %v3469_v0  ;;  %v4487_v39 = vsub.f32 %v11290_v32, %v11300_v35  ;;  %v11487_v13 = vsub.f32 %v6502_v11, %v6502_v11  ;;  %v380_v11 = vld [vmem:[%s11720_s12] sm:$0xff] }
  0xa2   : > { %10354 = vmatprep.mubr.msk.f32.mxu1 %vm440_vm2, %v11002_v18  ;;  %10357 = vmatprep.subr.mxu1 %v3958_v2 }
  0xa3   : > { %v11321_v43 = vand.u32 4294901760, %v4487_v39 }
  0xa7   : > { %10325 = vmatmul.mubr.msk.f32.vlgmr.msra.gmra.mrb[6].mxu0 %vm440_vm2, %v11009_v22  ;;  %10355 = vmatmul.mubr.msk.f32.vlgmr.msra.gmra.mrb[6].mxu1 %vm440_vm2, %v11009_v22 }
  0xa8   : > { %10328 = vmatpush3.msra.mxu0 %v3469_v0  ;;  %10358 = vmatpush3.msra.mxu1 %v3958_v2  ;;  %v6480_v0 = vld [vmem:[%s11417_s8 + $0x8] sm:$0x3f] }
  0xa9   : > { %10329 = vmatprep.mubr.f32.mxu0 %v11011_v23  ;;  %10332 = vmatprep.subr.mxu0 %v11167_v62  ;;  %v6998_v2 = vsel %vm6504_vm1, %v6480_v0, 0 }
  0xaa   : > { %10359 = vmatprep.mubr.f32.mxu1 %v11011_v23  ;;  %10362 = vmatprep.subr.mxu1 %v11169_v63  ;;  %v4416_v23 = vsel %vm4414_vm9, %v4391_v16, 0  ;;  %v11471_v8 = vand.u32 4294901760, %v6998_v2 }
  0xab   : > { %v11272_v26 = vand.u32 4294901760, %v4416_v23 }
  0xac   : > { %v7088_v12 = vsub.f32 %v6998_v2, %v11471_v8 }
  0xad   : > { %v4506_v33 = vsub.f32 %v4416_v23, %v11272_v26 }
  0xae   : > { %v7089_v23 = vand.u32 4294901760, %v7088_v12 }
  0xaf   : > { %10330 = vmatmul.mubr.f32.vlgmr.msra.gmra.mrb[6].mxu0 %v11015_v27  ;;  %10360 = vmatmul.mubr.f32.vlgmr.msra.gmra.mrb[6].mxu1 %v11015_v27  ;;  %v11275_v27 = vsel %vm4402_vm13, 1.0, %v10907_v17  ;;  %v4507_v36 = vand.u32 4294901760, %v4506_v33 }
  0xb0   : > { %10333 = vmatpush3.msra.mxu0 %v11167_v62  ;;  %10363 = vmatpush3.msra.mxu1 %v11169_v63  ;;  %v4412_v30 = vsel %vm4407_vm14, %v11275_v27, 0  ;;  %v7090_v29 = vsub.f32 %v7088_v12, %v7089_v23 }
  0xb1   : > { %10334 = vmatprep.mubr.f32.mxu0 %v11018_v28  ;;  %10337 = vmatprep.subr.mxu0 %v11181_v4  ;;  %v11297_v34 = vsub.f32 %v4412_v30, %v4412_v30  ;;  %v4508_v40 = vsub.f32 %v4506_v33, %v4507_v36 }
  0xb2   : > { %10364 = vmatprep.mubr.f32.mxu1 %v11018_v28  ;;  %10367 = vmatprep.subr.mxu1 %v11183_v5  ;;  %v11277_v28 = vand.u32 4294901760, %v4908_v24 }
  0xb3   : > { %v11307_v38 = vand.u32 4294901760, %v11297_v34  ;;  %v4509_v44 = vand.u32 4294901760, %v4508_v40 }
  0xb5   : > { %v4497_v42 = vsub.f32 %v11297_v34, %v11307_v38 }
  0xb7   : > { %10335 = vmatmul.mubr.f32.vlgmr.msra.gmra.mrb[6].mxu0 %v11021_v31  ;;  %10365 = vmatmul.mubr.f32.vlgmr.msra.gmra.mrb[6].mxu1 %v11021_v31  ;;  %v4998_v31 = vsub.f32 %v4908_v24, %v11277_v28  ;;  %v11503_v24 = vand.u32 4294901760, %v11487_v13 }
  0xb8   : > { %10338 = vmatpush3.msra.mxu0 %v11181_v4  ;;  %10368 = vmatpush3.msra.mxu1 %v11183_v5  ;;  %v11462_v4 = vand.u32 4294901760, %v6506_v3 }
  0xb9   : > { %10339 = vmatprep.mubr.msk.f32.mxu0 %vm440_vm2, %v11002_v18  ;;  %10342 = vmatprep.subr.mxu0 %v11167_v62  ;;  %v4999_v37 = vand.u32 4294901760, %v4998_v31  ;;  %v6587_v30 = vsub.f32 %v11487_v13, %v11503_v24 }
  0xba   : > { %10369 = vmatprep.mubr.msk.f32.mxu1 %vm440_vm2, %v11002_v18  ;;  %10372 = vmatprep.subr.mxu1 %v11169_v63 }
  0xbb   : > { %v5000_v41 = vsub.f32 %v4998_v31, %v4999_v37 }
  0xbd   : > { %v5001_v45 = vand.u32 4294901760, %v5000_v41 }
  0xbf   : > { %10340 = vmatmul.mubr.msk.f32.vlgmr.msra.gmra.mrb[6].mxu0 %vm440_vm2, %v11009_v22  ;;  %10370 = vmatmul.mubr.msk.f32.vlgmr.msra.gmra.mrb[6].mxu1 %vm440_vm2, %v11009_v22 }
  0xc0   : > { %10343 = vmatpush3.msra.mxu0 %v11167_v62  ;;  %10373 = vmatpush3.msra.mxu1 %v11169_v63 }
  0xc1   : > { %10344 = vmatprep.mubr.msk.f32.mxu0 %vm440_vm2, %v11002_v18  ;;  %10374 = vmatprep.mubr.msk.f32.mxu1 %vm440_vm2, %v11002_v18  ;;  %v11327_v18 = vand.u32 4294901760, %v4497_v42 }
  0xc2   : > { %10377 = vmatprep.subr.mxu0 %v11272_v26  ;;  %10407 = vmatprep.subr.mxu1 %v11277_v28 }
  0xc7   : > { %10345 = vmatmul.mubr.msk.f32.vlgmr.msra.gmra.mrb[6].mxu0 %vm440_vm2, %v11009_v22  ;;  %10375 = vmatmul.mubr.msk.f32.vlgmr.msra.gmra.mrb[6].mxu1 %vm440_vm2, %v11009_v22  ;;  %v4393_v22 = vld [vmem:[%s11227_s29 + $0x8] sm:$0xf]  ;;  %vm6491_vm2 = vmand %vm11420_vm15, %vm11425_vm0 }
  0xc8   : > { %10378 = vmatpush3.msra.mxu0 %v11272_v26  ;;  %10408 = vmatpush3.msra.mxu1 %v11277_v28  ;;  %v5400_v47 = vsel %vm4414_vm9, %v4393_v22, 0  ;;  %v11455_v10 = vsel %vm6491_vm2, 1.0, %v10907_v17  ;;  %v6596_v17 = vsub.f32 %v6506_v3, %v11462_v4 }
  0xc9   : > { %10379 = vmatprep.mubr.f32.mxu0 %v11321_v43  ;;  %10382 = vmatprep.subr.mxu0 %v4509_v44  ;;  %v11357_v49 = vand.u32 4294901760, %v5400_v47  ;;  %v6499_v5 = vsel %vm6497_vm5, %v11455_v10, 0 }
  0xca   : > { %10409 = vmatprep.mubr.f32.mxu1 %v11321_v43  ;;  %10412 = vmatprep.subr.mxu1 %v5001_v45  ;;  %v11475_v9 = vsub.f32 %v6499_v5, %v6499_v5  ;;  %v6597_v15 = vand.u32 4294901760, %v6596_v17 }
  0xcb   : > { %10380 = vmatmul.mubr.f32.vlgmr.msra.gmra.mrb[8].mxu0 %v11327_v18  ;;  %10410 = vmatmul.mubr.f32.vlgmr.msra.gmra.mrb[8].mxu1 %v11327_v18  ;;  %v5490_v51 = vsub.f32 %v5400_v47, %v11357_v49 }
  0xcc   : > { %10383 = vmatpush3.msra.mxu0 %v4509_v44  ;;  %10413 = vmatpush3.msra.mxu1 %v5001_v45  ;;  %v11490_v14 = vand.u32 4294901760, %v11475_v9 }
  0xcd   : > { %10384 = vmatprep.mubr.msk.f32.mxu0 %vm4407_vm14, %v11270_v25  ;;  %10387 = vmatprep.subr.mxu0 %v4506_v33  ;;  %v11371_v53 = vand.u32 4294901760, %v5490_v51 }
  0xce   : > { %10414 = vmatprep.mubr.msk.f32.mxu1 %vm4407_vm14, %v11270_v25  ;;  %10417 = vmatprep.subr.mxu1 %v4998_v31 }
  0xcf   : > { %v5492_v55 = vsub.f32 %v5490_v51, %v11371_v53 }
  0xd1   : > { %v5493_v57 = vand.u32 4294901760, %v5492_v55 }
  0xd3   : > { %10385 = vmatmul.mubr.msk.f32.vlgmr.msra.gmra.mrb[8].mxu0 %vm4407_vm14, %v11275_v27  ;;  %10415 = vmatmul.mubr.msk.f32.vlgmr.msra.gmra.mrb[8].mxu1 %vm4407_vm14, %v11275_v27 }
  0xd4   : > { %10388 = vmatpush3.msra.mxu0 %v4506_v33  ;;  %10418 = vmatpush3.msra.mxu1 %v4998_v31  ;;  %v7091_v31 = vand.u32 4294901760, %v7090_v29 }
  0xd5   : > { %10389 = vmatprep.mubr.f32.mxu0 %v11290_v32  ;;  %10392 = vmatprep.subr.mxu0 %v11272_v26 }
  0xd6   : > { %10419 = vmatprep.mubr.f32.mxu1 %v11290_v32  ;;  %10422 = vmatprep.subr.mxu1 %v11277_v28 }
  0xdb   : > { %10390 = vmatmul.mubr.f32.vlgmr.msra.gmra.mrb[8].mxu0 %v11297_v34  ;;  %10420 = vmatmul.mubr.f32.vlgmr.msra.gmra.mrb[8].mxu1 %v11297_v34 }
  0xdc   : > { %10393 = vmatpush3.msra.mxu0 %v11272_v26  ;;  %10423 = vmatpush3.msra.mxu1 %v11277_v28 }
  0xdd   : > { %10394 = vmatprep.mubr.f32.mxu0 %v11300_v35  ;;  %10397 = vmatprep.subr.mxu0 %v4507_v36 }
  0xde   : > { %10424 = vmatprep.mubr.f32.mxu1 %v11300_v35  ;;  %10427 = vmatprep.subr.mxu1 %v4999_v37 }
  0xe3   : > { %10395 = vmatmul.mubr.f32.vlgmr.msra.gmra.mrb[8].mxu0 %v11307_v38  ;;  %10425 = vmatmul.mubr.f32.vlgmr.msra.gmra.mrb[8].mxu1 %v11307_v38 }
  0xe4   : > { %10398 = vmatpush3.msra.mxu0 %v4507_v36  ;;  %10428 = vmatpush3.msra.mxu1 %v4999_v37 }
  0xe5   : > { %10399 = vmatprep.mubr.msk.f32.mxu0 %vm4407_vm14, %v11270_v25  ;;  %10402 = vmatprep.subr.mxu0 %v11272_v26 }
  0xe6   : > { %10429 = vmatprep.mubr.msk.f32.mxu1 %vm4407_vm14, %v11270_v25  ;;  %10432 = vmatprep.subr.mxu1 %v11277_v28 }
  0xeb   : > { %10400 = vmatmul.mubr.msk.f32.vlgmr.msra.gmra.mrb[8].mxu0 %vm4407_vm14, %v11275_v27  ;;  %10430 = vmatmul.mubr.msk.f32.vlgmr.msra.gmra.mrb[8].mxu1 %vm4407_vm14, %v11275_v27 }
  0xec   : > { %10403 = vmatpush3.msra.mxu0 %v11272_v26  ;;  %10433 = vmatpush3.msra.mxu1 %v11277_v28  ;;  %v6577_v26 = vsub.f32 %v11475_v9, %v11490_v14  ;;  %v6598_v28 = vsub.f32 %v6596_v17, %v6597_v15 }
  0xed   : > { %10404 = vmatprep.mubr.msk.f32.mxu0 %vm4407_vm14, %v11270_v25  ;;  %10434 = vmatprep.mubr.msk.f32.mxu1 %vm4407_vm14, %v11270_v25 }
  0xee   : > { %10437 = vmatprep.subr.mxu0 %v11357_v49  ;;  %10467 = vmatprep.subr.mxu1 %v11359_v50  ;;  %v6599_v33 = vand.u32 4294901760, %v6598_v28 }
  0xf3   : > { %10405 = vmatmul.mubr.msk.f32.vlgmr.msra.gmra.mrb[8].mxu0 %vm4407_vm14, %v11275_v27  ;;  %10435 = vmatmul.mubr.msk.f32.vlgmr.msra.gmra.mrb[8].mxu1 %vm4407_vm14, %v11275_v27 }
  0xf4   : > { %10438 = vmatpush3.msra.mxu0 %v11357_v49  ;;  %10468 = vmatpush3.msra.mxu1 %v11359_v50 }
  0xf5   : > { %10439 = vmatprep.mubr.f32.mxu0 %v11321_v43  ;;  %10442 = vmatprep.subr.mxu0 %v5493_v57 }
  0xf6   : > { %10469 = vmatprep.mubr.f32.mxu1 %v11321_v43  ;;  %10472 = vmatprep.subr.mxu1 %v5985_v58 }
  0xf7   : > { %10440 = vmatmul.mubr.f32.vlgmr.msra.gmra.mrb[10].mxu0 %v11327_v18  ;;  %10470 = vmatmul.mubr.f32.vlgmr.msra.gmra.mrb[10].mxu1 %v11327_v18 }
  0xf8   : > { %10443 = vmatpush3.msra.mxu0 %v5493_v57  ;;  %10473 = vmatpush3.msra.mxu1 %v5985_v58 }
  0xf9   : > { %10444 = vmatprep.mubr.msk.f32.mxu0 %vm4407_vm14, %v11270_v25  ;;  %10447 = vmatprep.subr.mxu0 %v5490_v51 }
  0xfa   : > { %10474 = vmatprep.mubr.msk.f32.mxu1 %vm4407_vm14, %v11270_v25  ;;  %10477 = vmatprep.subr.mxu1 %v5982_v52 }
  0xff   : > { %10445 = vmatmul.mubr.msk.f32.vlgmr.msra.gmra.mrb[10].mxu0 %vm4407_vm14, %v11275_v27  ;;  %10475 = vmatmul.mubr.msk.f32.vlgmr.msra.gmra.mrb[10].mxu1 %vm4407_vm14, %v11275_v27 }
 0x100   : > { %10448 = vmatpush3.msra.mxu0 %v5490_v51  ;;  %10478 = vmatpush3.msra.mxu1 %v5982_v52 }
 0x101   : > { %10449 = vmatprep.mubr.f32.mxu0 %v11290_v32  ;;  %10452 = vmatprep.subr.mxu0 %v11357_v49 }
 0x102   : > { %10479 = vmatprep.mubr.f32.mxu1 %v11290_v32  ;;  %10482 = vmatprep.subr.mxu1 %v11359_v50  ;;  %v11519_v32 = vand.u32 4294901760, %v6577_v26 }
 0x107   : > { %10450 = vmatmul.mubr.f32.vlgmr.msra.gmra.mrb[10].mxu0 %v11297_v34  ;;  %10480 = vmatmul.mubr.f32.vlgmr.msra.gmra.mrb[10].mxu1 %v11297_v34  ;;  %v11523_v34 = vand.u32 4294901760, %v6587_v30 }
 0x108   : > { %10453 = vmatpush3.msra.mxu0 %v11357_v49  ;;  %10483 = vmatpush3.msra.mxu1 %v11359_v50 }
 0x109   : > { %10454 = vmatprep.mubr.f32.mxu0 %v11300_v35  ;;  %10457 = vmatprep.subr.mxu0 %v11371_v53 }
 0x10a   : > { %10484 = vmatprep.mubr.f32.mxu1 %v11300_v35  ;;  %10487 = vmatprep.subr.mxu1 %v11373_v54 }
 0x10f   : > { %10455 = vmatmul.mubr.f32.vlgmr.msra.gmra.mrb[10].mxu0 %v11307_v38  ;;  %10485 = vmatmul.mubr.f32.vlgmr.msra.gmra.mrb[10].mxu1 %v11307_v38 }
 0x110   : > { %10458 = vmatpush3.msra.mxu0 %v11371_v53  ;;  %10488 = vmatpush3.msra.mxu1 %v11373_v54 }
 0x111   : > { %10459 = vmatprep.mubr.msk.f32.mxu0 %vm4407_vm14, %v11270_v25  ;;  %10462 = vmatprep.subr.mxu0 %v11357_v49 }
 0x112   : > { %10489 = vmatprep.mubr.msk.f32.mxu1 %vm4407_vm14, %v11270_v25  ;;  %10492 = vmatprep.subr.mxu1 %v11359_v50 }
 0x116   : > { %v11492_v16 = vpop.f32.mrb[0].mxu0  ;;  %v11494_v19 = vpop.f32.mrb[0].mxu1 }
 0x117   : > { %v11496_v20 = vpop.f32.mrb[1].mxu0  ;;  %v11498_v21 = vpop.f32.mrb[1].mxu1  ;;  %10460 = vmatmul.mubr.msk.f32.vlgmr.msra.gmra.mrb[10].mxu0 %vm4407_vm14, %v11275_v27  ;;  %10490 = vmatmul.mubr.msk.f32.vlgmr.msra.gmra.mrb[10].mxu1 %vm4407_vm14, %v11275_v27 }
 0x118   : > { %10463 = vmatpush3.msra.mxu0 %v11357_v49  ;;  %10464 = vmatprep.mubr.msk.f32.mxu0 %vm4407_vm14, %v11270_v25  ;;  %v6483_v49 = vld [vmem:[%s11417_s8 + $0x20] sm:$0x3f] }
 0x119   : > { %10493 = vmatpush3.msra.mxu1 %v11359_v50  ;;  %10494 = vmatprep.mubr.msk.f32.mxu1 %vm4407_vm14, %v11270_v25  ;;  %v6481_v25 = vld [vmem:[%s11417_s8 + $0x10] sm:$0x3f]  ;;  %v6484_v50 = vld [vmem:[%s11417_s8 + $0x28] sm:$0x3f]  ;;  %v8474_v51 = vsel %vm6504_vm1, %v6483_v49, 0 }
 0x11a   : > { %10497 = vmatprep.subr.mxu0 %v11462_v4  ;;  %10527 = vmatprep.subr.mxu1 %v11471_v8  ;;  %v7490_v35 = vsel %vm6504_vm1, %v6481_v25, 0  ;;  %v8966_v52 = vsel %vm6504_vm1, %v6484_v50, 0  ;;  %v11621_v53 = vand.u32 4294901760, %v8474_v51 }
 0x11b   : > { %v11555_v37 = vand.u32 4294901760, %v7490_v35  ;;  %v11624_v54 = vand.u32 4294901760, %v8966_v52 }
 0x11c   : > { %v8564_v55 = vsub.f32 %v8474_v51, %v11621_v53 }
 0x11d   : > { %v7580_v39 = vsub.f32 %v7490_v35, %v11555_v37  ;;  %v9056_v56 = vsub.f32 %v8966_v52, %v11624_v54 }
 0x11e   : > { %v8565_v57 = vand.u32 4294901760, %v8564_v55 }
 0x11f   : > { %10465 = vmatmul.mubr.msk.f32.vlgmr.msra.gmra.mrb[10].mxu0 %vm4407_vm14, %v11275_v27  ;;  %10495 = vmatmul.mubr.msk.f32.vlgmr.msra.gmra.mrb[10].mxu1 %vm4407_vm14, %v11275_v27  ;;  %v6482_v27 = vld [vmem:[%s11417_s8 + $0x18] sm:$0x3f]  ;;  %v7581_v41 = vand.u32 4294901760, %v7580_v39  ;;  %v9057_v61 = vand.u32 4294901760, %v9056_v56 }
 0x120   : > { %10498 = vmatpush3.msra.mxu0 %v11462_v4  ;;  %10499 = vmatprep.mubr.f32.mxu0 %v11519_v32  ;;  %v7982_v36 = vsel %vm6504_vm1, %v6482_v27, 0  ;;  %v8566_v6 = vsub.f32 %v8564_v55, %v8565_v57 }
 0x121   : > { %10502 = vmatprep.subr.mxu0 %v6599_v33  ;;  %10528 = vmatpush3.msra.mxu1 %v11471_v8  ;;  %v11558_v38 = vand.u32 4294901760, %v7982_v36  ;;  %v7582_v22 = vsub.f32 %v7580_v39, %v7581_v41  ;;  %v9058_v62 = vsub.f32 %v9056_v56, %v9057_v61 }
 0x122   : > { %10529 = vmatprep.mubr.f32.mxu1 %v11519_v32  ;;  %10532 = vmatprep.subr.mxu1 %v7091_v31  ;;  %v8567_v63 = vand.u32 4294901760, %v8566_v6 }
 0x123   : > { %10500 = vmatmul.mubr.f32.vlgmr.msra.gmra.mrb[12].mxu0 %v11523_v34  ;;  %10530 = vmatmul.mubr.f32.vlgmr.msra.gmra.mrb[12].mxu1 %v11523_v34  ;;  %v8072_v40 = vsub.f32 %v7982_v36, %v11558_v38  ;;  %v7583_v47 = vand.u32 4294901760, %v7582_v22  ;;  %v9059_v0 = vand.u32 4294901760, %v9058_v62  ;;  %v392_v22 = vld [vmem:[%s11720_s12 + $0x60] sm:$0xff] }
 0x124   : > { %10503 = vmatpush3.msra.mxu0 %v6599_v33  ;;  %10504 = vmatprep.mubr.msk.f32.mxu0 %vm6497_vm5, %v11455_v10 }
 0x125   : > { %10507 = vmatprep.subr.mxu0 %v6596_v17  ;;  %10533 = vmatpush3.msra.mxu1 %v7091_v31  ;;  %v8073_v18 = vand.u32 4294901760, %v8072_v40 }
 0x126   : > { %10534 = vmatprep.mubr.msk.f32.mxu1 %vm6497_vm5, %v11455_v10  ;;  %10537 = vmatprep.subr.mxu1 %v7088_v12 }
 0x127   : > { %v8074_v46 = vsub.f32 %v8072_v40, %v8073_v18 }
 0x129   : > { %v8075_v48 = vand.u32 4294901760, %v8074_v46 }
 0x12b   : > { %10505 = vmatmul.mubr.msk.f32.vlgmr.msra.gmra.mrb[12].mxu0 %vm6497_vm5, %v11467_v7  ;;  %10535 = vmatmul.mubr.msk.f32.vlgmr.msra.gmra.mrb[12].mxu1 %vm6497_vm5, %v11467_v7 }
 0x12c   : > { %10508 = vmatpush3.msra.mxu0 %v6596_v17  ;;  %10509 = vmatprep.mubr.f32.mxu0 %v11475_v9  ;;  %v382_v17 = vld [vmem:[%s11720_s12 + $0x10] sm:$0xff] }
 0x12d   : > { %10512 = vmatprep.subr.mxu0 %v11462_v4  ;;  %10538 = vmatpush3.msra.mxu1 %v7088_v12  ;;  %v384_v12 = vld [vmem:[%s11720_s12 + $0x20] sm:$0xff]  ;;  %v4361_v33 = vadd.f32 %v11496_v20, %v382_v17  ;;  %v407_v17 = vld [vmem:[%s11720_s12 + $0xd8] sm:$0xff] }
 0x12e   : > { %10539 = vmatprep.mubr.f32.mxu1 %v11475_v9  ;;  %10542 = vmatprep.subr.mxu1 %v11471_v8  ;;  %v4363_v31 = vadd.f32 %v11498_v21, %v384_v12 }
 0x133   : > { %10510 = vmatmul.mubr.f32.vlgmr.msra.gmra.mrb[12].mxu0 %v11487_v13  ;;  %10540 = vmatmul.mubr.f32.vlgmr.msra.gmra.mrb[12].mxu1 %v11487_v13 }
 0x134   : > { %10513 = vmatpush3.msra.mxu0 %v11462_v4  ;;  %10514 = vmatprep.mubr.f32.mxu0 %v11490_v14 }
 0x135   : > { %10517 = vmatprep.subr.mxu0 %v6597_v15  ;;  %10543 = vmatpush3.msra.mxu1 %v11471_v8 }
 0x136   : > { %10544 = vmatprep.mubr.f32.mxu1 %v11490_v14  ;;  %10547 = vmatprep.subr.mxu1 %v7089_v23 }
 0x13b   : > { %10515 = vmatmul.mubr.f32.vlgmr.msra.gmra.mrb[12].mxu0 %v11503_v24  ;;  %10545 = vmatmul.mubr.f32.vlgmr.msra.gmra.mrb[12].mxu1 %v11503_v24 }
 0x13c   : > { %10518 = vmatpush3.msra.mxu0 %v6597_v15  ;;  %10519 = vmatprep.mubr.msk.f32.mxu0 %vm6497_vm5, %v11455_v10  ;;  %v391_v15 = vld [vmem:[%s11720_s12 + $0x58] sm:$0xff] }
 0x13d   : > { %10522 = vmatprep.subr.mxu0 %v11462_v4  ;;  %10548 = vmatpush3.msra.mxu1 %v7089_v23  ;;  %v388_v23 = vld [vmem:[%s11720_s12 + $0x40] sm:$0xff] }
 0x13e   : > { %10549 = vmatprep.mubr.msk.f32.mxu1 %vm6497_vm5, %v11455_v10  ;;  %10552 = vmatprep.subr.mxu1 %v11471_v8 }
 0x142   : > { %v11569_v42 = vpop.f32.mrb[2].mxu0  ;;  %v11571_v43 = vpop.f32.mrb[2].mxu1 }
 0x143   : > { %v11573_v44 = vpop.f32.mrb[3].mxu0  ;;  %v11575_v45 = vpop.f32.mrb[3].mxu1  ;;  %10520 = vmatmul.mubr.msk.f32.vlgmr.msra.gmra.mrb[12].mxu0 %vm6497_vm5, %v11467_v7  ;;  %10550 = vmatmul.mubr.msk.f32.vlgmr.msra.gmra.mrb[12].mxu1 %vm6497_vm5, %v11467_v7  ;;  %v4370_v27 = vadd.f32 %v11569_v42, %v391_v15 }
 0x144   : > { %10523 = vmatpush3.msra.mxu0 %v11462_v4  ;;  %10524 = vmatprep.mubr.msk.f32.mxu0 %vm6497_vm5, %v11455_v10 }
 0x145   : > { %10553 = vmatpush3.msra.mxu1 %v11471_v8  ;;  %10554 = vmatprep.mubr.msk.f32.mxu1 %vm6497_vm5, %v11455_v10  ;;  %v385_v8 = vld [vmem:[%s11720_s12 + $0x28] sm:$0xff] }
 0x146   : > { %10557 = vmatprep.subr.mxu0 %v11555_v37  ;;  %10587 = vmatprep.subr.mxu1 %v11558_v38  ;;  %v4364_v29 = vadd.f32 %v11494_v19, %v385_v8  ;;  %v396_v8 = vld [vmem:[%s11720_s12 + $0x80] sm:$0xff] }
 0x14b   : > { %10525 = vmatmul.mubr.msk.f32.vlgmr.msra.gmra.mrb[12].mxu0 %vm6497_vm5, %v11467_v7  ;;  %10555 = vmatmul.mubr.msk.f32.vlgmr.msra.gmra.mrb[12].mxu1 %vm6497_vm5, %v11467_v7 }
 0x14c   : > { %10558 = vmatpush3.msra.mxu0 %v11555_v37  ;;  %10559 = vmatprep.mubr.f32.mxu0 %v11519_v32 }
 0x14d   : > { %10562 = vmatprep.subr.mxu0 %v7583_v47  ;;  %10588 = vmatpush3.msra.mxu1 %v11558_v38 }
 0x14e   : > { %10589 = vmatprep.mubr.f32.mxu1 %v11519_v32  ;;  %10592 = vmatprep.subr.mxu1 %v8075_v48 }
 0x14f   : > { %10560 = vmatmul.mubr.f32.vlgmr.msra.gmra.mrb[14].mxu0 %v11523_v34  ;;  %10590 = vmatmul.mubr.f32.vlgmr.msra.gmra.mrb[14].mxu1 %v11523_v34 }
 0x150   : > { %10563 = vmatpush3.msra.mxu0 %v7583_v47  ;;  %10564 = vmatprep.mubr.msk.f32.mxu0 %vm6497_vm5, %v11455_v10 }
 0x151   : > { %10567 = vmatprep.subr.mxu0 %v7580_v39  ;;  %10593 = vmatpush3.msra.mxu1 %v8075_v48 }
 0x152   : > { %10594 = vmatprep.mubr.msk.f32.mxu1 %vm6497_vm5, %v11455_v10  ;;  %10597 = vmatprep.subr.mxu1 %v8072_v40 }
 0x157   : > { %10565 = vmatmul.mubr.msk.f32.vlgmr.msra.gmra.mrb[14].mxu0 %vm6497_vm5, %v11467_v7  ;;  %10595 = vmatmul.mubr.msk.f32.vlgmr.msra.gmra.mrb[14].mxu1 %vm6497_vm5, %v11467_v7 }
 0x158   : > { %10568 = vmatpush3.msra.mxu0 %v7580_v39  ;;  %10569 = vmatprep.mubr.f32.mxu0 %v11475_v9 }
 0x159   : > { %10572 = vmatprep.subr.mxu0 %v11555_v37  ;;  %10598 = vmatpush3.msra.mxu1 %v8072_v40 }
 0x15a   : > { %10599 = vmatprep.mubr.f32.mxu1 %v11475_v9  ;;  %10602 = vmatprep.subr.mxu1 %v11558_v38 }
 0x15f   : > { %10570 = vmatmul.mubr.f32.vlgmr.msra.gmra.mrb[14].mxu0 %v11487_v13  ;;  %10600 = vmatmul.mubr.f32.vlgmr.msra.gmra.mrb[14].mxu1 %v11487_v13 }
 0x160   : > { %10573 = vmatpush3.msra.mxu0 %v11555_v37  ;;  %10574 = vmatprep.mubr.f32.mxu0 %v11490_v14 }
 0x161   : > { %10577 = vmatprep.subr.mxu0 %v7581_v41  ;;  %10603 = vmatpush3.msra.mxu1 %v11558_v38 }
 0x162   : > { %10604 = vmatprep.mubr.f32.mxu1 %v11490_v14  ;;  %10607 = vmatprep.subr.mxu1 %v8073_v18 }
 0x167   : > { %10575 = vmatmul.mubr.f32.vlgmr.msra.gmra.mrb[14].mxu0 %v11503_v24  ;;  %10605 = vmatmul.mubr.f32.vlgmr.msra.gmra.mrb[14].mxu1 %v11503_v24 }
 0x168   : > { %10578 = vmatpush3.msra.mxu0 %v7581_v41  ;;  %10579 = vmatprep.mubr.msk.f32.mxu0 %vm6497_vm5, %v11455_v10 }
 0x169   : > { %10582 = vmatprep.subr.mxu0 %v11555_v37  ;;  %10608 = vmatpush3.msra.mxu1 %v8073_v18  ;;  %v395_v18 = vld [vmem:[%s11720_s12 + $0x78] sm:$0xff] }
 0x16a   : > { %10609 = vmatprep.mubr.msk.f32.mxu1 %vm6497_vm5, %v11455_v10  ;;  %10612 = vmatprep.subr.mxu1 %v11558_v38 }
 0x16e   : > { %v11635_v58 = vpop.f32.mrb[4].mxu0  ;;  %v11637_v59 = vpop.f32.mrb[4].mxu1 }
 0x16f   : > { %v11639_v60 = vpop.f32.mrb[5].mxu0  ;;  %v11641_v1 = vpop.f32.mrb[5].mxu1  ;;  %10580 = vmatmul.mubr.msk.f32.vlgmr.msra.gmra.mrb[14].mxu0 %vm6497_vm5, %v11467_v7  ;;  %10610 = vmatmul.mubr.msk.f32.vlgmr.msra.gmra.mrb[14].mxu1 %vm6497_vm5, %v11467_v7 }
 0x170   : > { %10583 = vmatpush3.msra.mxu0 %v11555_v37  ;;  %10584 = vmatprep.mubr.msk.f32.mxu0 %vm6497_vm5, %v11455_v10  ;;  %v393_v37 = vld [vmem:[%s11720_s12 + $0x68] sm:$0xff] }
 0x171   : > { %10613 = vmatpush3.msra.mxu1 %v11558_v38  ;;  %10614 = vmatprep.mubr.msk.f32.mxu1 %vm6497_vm5, %v11455_v10 }
 0x172   : > { %10617 = vmatprep.subr.mxu0 %v11621_v53  ;;  %10647 = vmatprep.subr.mxu1 %v11624_v54 }
 0x177   : > { %10585 = vmatmul.mubr.msk.f32.vlgmr.msra.gmra.mrb[14].mxu0 %vm6497_vm5, %v11467_v7  ;;  %10615 = vmatmul.mubr.msk.f32.vlgmr.msra.gmra.mrb[14].mxu1 %vm6497_vm5, %v11467_v7 }
 0x178   : > { %10618 = vmatpush3.msra.mxu0 %v11621_v53  ;;  %10619 = vmatprep.mubr.f32.mxu0 %v11519_v32 }
 0x179   : > { %10622 = vmatprep.subr.mxu0 %v8567_v63  ;;  %10648 = vmatpush3.msra.mxu1 %v11624_v54 }
 0x17a   : > { %10649 = vmatprep.mubr.f32.mxu1 %v11519_v32  ;;  %10652 = vmatprep.subr.mxu1 %v9059_v0  ;;  %v4359_v32 = vadd.f32 %v11496_v20, %v380_v11  ;;  %v402_v11 = vld [vmem:[%s11720_s12 + $0xb0] sm:$0xff] }
 0x17b   : > { %10620 = vmatmul.mubr.f32.vlgmr.msra.gmra.mrb[16].mxu0 %v11523_v34  ;;  %10650 = vmatmul.mubr.f32.vlgmr.msra.gmra.mrb[16].mxu1 %v11523_v34 }
 0x17c   : > { %10623 = vmatpush3.msra.mxu0 %v8567_v63  ;;  %10624 = vmatprep.mubr.msk.f32.mxu0 %vm6497_vm5, %v11455_v10  ;;  %v397_v63 = vld [vmem:[%s11720_s12 + $0x88] sm:$0xff] }
 0x17d   : > { %10627 = vmatprep.subr.mxu0 %v8564_v55  ;;  %10653 = vmatpush3.msra.mxu1 %v9059_v0  ;;  %v399_v0 = vld [vmem:[%s11720_s12 + $0x98] sm:$0xff]  ;;  %v4376_v12 = vadd.f32 %v11635_v58, %v397_v63  ;;  %v6437_v63 = vld [vmem:[%s11813_s15 + $0xb0] sm:$0xff] }
 0x17e   : > { %10654 = vmatprep.mubr.msk.f32.mxu1 %vm6497_vm5, %v11455_v10  ;;  %10657 = vmatprep.subr.mxu1 %v9056_v56 }
 0x183   : > { %10625 = vmatmul.mubr.msk.f32.vlgmr.msra.gmra.mrb[16].mxu0 %vm6497_vm5, %v11467_v7  ;;  %10655 = vmatmul.mubr.msk.f32.vlgmr.msra.gmra.mrb[16].mxu1 %vm6497_vm5, %v11467_v7 }
 0x184   : > { %10628 = vmatpush3.msra.mxu0 %v8564_v55  ;;  %10629 = vmatprep.mubr.f32.mxu0 %v11475_v9  ;;  %v4371_v55 = vadd.f32 %v11575_v45, %v392_v22 }
 0x185   : > { %10632 = vmatprep.subr.mxu0 %v11621_v53  ;;  %10658 = vmatpush3.msra.mxu1 %v9056_v56 }
 0x186   : > { %10659 = vmatprep.mubr.f32.mxu1 %v11475_v9  ;;  %10662 = vmatprep.subr.mxu1 %v11624_v54  ;;  %v387_v9 = vld [vmem:[%s11720_s12 + $0x38] sm:$0xff] }
 0x187   : > { %v4366_v30 = vadd.f32 %v11494_v19, %v387_v9  ;;  %v400_v9 = vld [vmem:[%s11720_s12 + $0xa0] sm:$0xff] }
 0x18b   : > { %10630 = vmatmul.mubr.f32.vlgmr.msra.gmra.mrb[16].mxu0 %v11487_v13  ;;  %10660 = vmatmul.mubr.f32.vlgmr.msra.gmra.mrb[16].mxu1 %v11487_v13  ;;  %v386_v13 = vld [vmem:[%s11720_s12 + $0x30] sm:$0xff] }
 0x18c   : > { %10633 = vmatpush3.msra.mxu0 %v11621_v53  ;;  %10634 = vmatprep.mubr.f32.mxu0 %v11490_v14  ;;  %v4365_v34 = vadd.f32 %v11498_v21, %v386_v13  ;;  %v4378_v13 = vadd.f32 %v11635_v58, %v399_v0  ;;  %v404_v58 = vld [vmem:[%s11720_s12 + $0xc0] sm:$0xff] }
 0x18d   : > { %10637 = vmatprep.subr.mxu0 %v8565_v57  ;;  %10663 = vmatpush3.msra.mxu1 %v11624_v54 }
 0x18e   : > { %10664 = vmatprep.mubr.f32.mxu1 %v11490_v14  ;;  %10667 = vmatprep.subr.mxu1 %v9057_v61  ;;  %v389_v14 = vld [vmem:[%s11720_s12 + $0x48] sm:$0xff] }
 0x18f   : > { %v4368_v25 = vadd.f32 %v11569_v42, %v389_v14  ;;  %v394_v42 = vld [vmem:[%s11720_s12 + $0x70] sm:$0xff] }
 0x190   : > { %v4373_v56 = vadd.f32 %v11575_v45, %v394_v42  ;;  %v405_v45 = vld [vmem:[%s11720_s12 + $0xc8] sm:$0xff] }
 0x193   : > { %10635 = vmatmul.mubr.f32.vlgmr.msra.gmra.mrb[16].mxu0 %v11503_v24  ;;  %10665 = vmatmul.mubr.f32.vlgmr.msra.gmra.mrb[16].mxu1 %v11503_v24  ;;  %v390_v24 = vld [vmem:[%s11720_s12 + $0x50] sm:$0xff] }
 0x194   : > { %10638 = vmatpush3.msra.mxu0 %v8565_v57  ;;  %10639 = vmatprep.mubr.msk.f32.mxu0 %vm6497_vm5, %v11455_v10  ;;  %v4369_v35 = vadd.f32 %v11573_v44, %v390_v24 }
 0x195   : > { %10642 = vmatprep.subr.mxu0 %v11621_v53  ;;  %10668 = vmatpush3.msra.mxu1 %v9057_v61 }
 0x196   : > { %10669 = vmatprep.mubr.msk.f32.mxu1 %vm6497_vm5, %v11455_v10  ;;  %10672 = vmatprep.subr.mxu1 %v11624_v54 }
 0x19a   : > { %v11691_v3 = vpop.f32.mrb[6].mxu0  ;;  %v11693_v2 = vpop.f32.mrb[6].mxu1 }
 0x19b   : > { %v11695_v4 = vpop.f32.mrb[7].mxu0  ;;  %v11697_v5 = vpop.f32.mrb[7].mxu1  ;;  %10640 = vmatmul.mubr.msk.f32.vlgmr.msra.gmra.mrb[16].mxu0 %vm6497_vm5, %v11467_v7  ;;  %10670 = vmatmul.mubr.msk.f32.vlgmr.msra.gmra.mrb[16].mxu1 %vm6497_vm5, %v11467_v7 }
 0x19c   : > { %10643 = vmatpush3.msra.mxu0 %v11621_v53  ;;  %10644 = vmatprep.mubr.msk.f32.mxu0 %vm6497_vm5, %v11455_v10  ;;  %v4372_v53 = vadd.f32 %v11571_v43, %v393_v37  ;;  %v4383_v0 = vadd.f32 %v11695_v4, %v404_v58 }
 0x19d   : > { %10673 = vmatpush3.msra.mxu1 %v11624_v54  ;;  %10674 = vmatprep.mubr.msk.f32.mxu1 %vm6497_vm5, %v11455_v10  ;;  %v381_v10 = vld [vmem:[%s11720_s12 + $0x8] sm:$0xff]  ;;  %v4374_v54 = vadd.f32 %v11571_v43, %v395_v18  ;;  %v398_v43 = vld [vmem:[%s11720_s12 + $0x90] sm:$0xff]  ;;  %v6442_v18 = vld [vmem:[%s11813_s15 + $0xd8] sm:$0xff] }
 0x19e   : > { %v4360_v26 = vadd.f32 %v11492_v16, %v381_v10  ;;  %v401_v10 = vld [vmem:[%s11720_s12 + $0xa8] sm:$0xff]  ;;  %v4377_v24 = vadd.f32 %v11639_v60, %v398_v43 }
 0x19f   : > { %v4380_v14 = vadd.f32 %v11637_v59, %v401_v10  ;;  %v6444_v43 = vld [vmem:[%s11813_s15 + $0xe8] sm:$0xff] }
 0x1a3   : > { %10645 = vmatmul.mubr.msk.f32.vlgmr.msra.gmra.mrb[16].mxu0 %vm6497_vm5, %v11467_v7  ;;  %10675 = vmatmul.mubr.msk.f32.vlgmr.msra.gmra.mrb[16].mxu1 %vm6497_vm5, %v11467_v7  ;;  %v383_v7 = vld [vmem:[%s11720_s12 + $0x18] sm:$0xff] }
 0x1a4   : > { %v4362_v28 = vadd.f32 %v11492_v16, %v383_v7  ;;  %v4367_v16 = vadd.f32 %v11573_v44, %v388_v23  ;;  %v403_v7 = vld [vmem:[%s11720_s12 + $0xb8] sm:$0xff]  ;;  %v4375_v23 = vadd.f32 %v11639_v60, %v396_v8  ;;  %v408_v60 = vld [vmem:[%s11720_s12 + $0xe0] sm:$0xff] }
 0x1a5   : > { %v4382_v15 = vadd.f32 %v11637_v59, %v403_v7  ;;  %v406_v59 = vld [vmem:[%s11720_s12 + $0xd0] sm:$0xff]  ;;  %v4387_v7 = vadd.f32 %v11697_v5, %v408_v60  ;;  %v6418_v60 = vld [vmem:[%s11813_s15 + $0x18] sm:$0xff] }
 0x1a6   : > { %v4385_v10 = vadd.f32 %v11695_v4, %v406_v59  ;;  %v6416_v59 = vld [vmem:[%s11813_s15 + $0x8] sm:$0xff] }
 0x1c6   : > { %v10406_v19 = vpop.f32.mrb[8].mxu0  ;;  %v10436_v36 = vpop.f32.mrb[8].mxu1 }
 0x1c7   : > { %v11747_v38 = vadd.f32 %v10406_v19, %v4360_v26  ;;  %v11749_v20 = vadd.f32 %v10406_v19, %v4362_v28  ;;  %v11751_v39 = vadd.f32 %v10406_v19, %v4364_v29  ;;  %v11753_v40 = vadd.f32 %v10406_v19, %v4366_v30  ;;  %v4897_v21 = vpop.f32.mrb[9].mxu0  ;;  %v5389_v41 = vpop.f32.mrb[9].mxu1 }
 0x1c8   : > { %v11758_v46 = vadd.f32 %v10436_v36, %v4368_v25  ;;  %v11760_v44 = vadd.f32 %v10436_v36, %v4370_v27  ;;  %v11762_v47 = vadd.f32 %v4897_v21, %v4359_v32  ;;  %v11764_v48 = vadd.f32 %v4897_v21, %v4361_v33  ;;  %v409_v32 = vld [vmem:[%s11720_s12 + $0xe8] sm:$0xff]  ;;  %v411_v33 = vld [vmem:[%s11720_s12 + $0xf8] sm:$0xff] }
 0x1c9   : > { %v11766_v49 = vadd.f32 %v4897_v21, %v4363_v31  ;;  %v11768_v50 = vadd.f32 %v4897_v21, %v4365_v34  ;;  %v11770_v51 = vadd.f32 %v5389_v41, %v4367_v16  ;;  %v11772_v52 = vadd.f32 %v5389_v41, %v4369_v35  ;;  %v410_v34 = vld [vmem:[%s11720_s12 + $0xf0] sm:$0xff]  ;;  %v6438_v21 = vld [vmem:[%s11813_s15 + $0xb8] sm:$0xff] }
 0x1ca   : > { %v11778_v57 = vadd.f32 %v10436_v36, %v4372_v53  ;;  %v11780_v61 = vadd.f32 %v10436_v36, %v4374_v54  ;;  %v11782_v6 = vadd.f32 %v5389_v41, %v4371_v55  ;;  %v11784_v62 = vadd.f32 %v5389_v41, %v4373_v56  ;;  %v6440_v41 = vld [vmem:[%s11813_s15 + $0xc8] sm:$0xff] }
 0x1cb   : > { %v4379_v26 = vadd.f32 %v11641_v1, %v400_v9  ;;  %v4381_v28 = vadd.f32 %v11641_v1, %v402_v11  ;;  %v4384_v29 = vadd.f32 %v11691_v3, %v405_v45  ;;  %v4386_v30 = vadd.f32 %v11691_v3, %v407_v17  ;;  %v6446_v17 = vld [vmem:[%s11813_s15 + $0xf8] sm:$0xff] }
 0x1cc   : > { %v4388_v42 = vadd.f32 %v11693_v2, %v409_v32  ;;  %v4390_v53 = vadd.f32 %v11693_v2, %v411_v33  ;;  %v4389_v8 = vadd.f32 %v11697_v5, %v410_v34  ;;  %v6420_v34 = vld [vmem:[%s11813_s15 + $0x28] sm:$0xff] }
 0x1f2   : > { %v10466_v31 = vpop.f32.mrb[10].mxu0  ;;  %v10496_v35 = vpop.f32.mrb[10].mxu1 }
 0x1f3   : > { %v11818_v1 = vadd.f32 %v10466_v31, %v4376_v12  ;;  %v11820_v25 = vadd.f32 %v10466_v31, %v4378_v13  ;;  %v11822_v3 = vadd.f32 %v10466_v31, %v4380_v14  ;;  %v6406_v27 = vadd.f32 %v10466_v31, %v4382_v15  ;;  %v5881_v16 = vpop.f32.mrb[11].mxu0  ;;  %v6373_v56 = vpop.f32.mrb[11].mxu1  ;;  %v6439_v12 = vld [vmem:[%s11813_s15 + $0xc0] sm:$0xff]  ;;  %v6441_v13 = vld [vmem:[%s11813_s15 + $0xd0] sm:$0xff] }
 0x1f4   : > { %v11824_v19 = vadd.f32 %v5881_v16, %v4375_v23  ;;  %v11826_v36 = vadd.f32 %v5881_v16, %v4377_v24  ;;  %v11828_v37 = vadd.f32 %v5881_v16, %v4379_v26  ;;  %v6405_v22 = vadd.f32 %v5881_v16, %v4381_v28  ;;  %v6443_v23 = vld [vmem:[%s11813_s15 + $0xe0] sm:$0xff]  ;;  %v6445_v24 = vld [vmem:[%s11813_s15 + $0xf0] sm:$0xff]  ;;  %v6424_v16 = vld [vmem:[%s11813_s15 + $0x48] sm:$0xff] }
 0x1f5   : > { %v6408_v54 = vadd.f32 %v10496_v35, %v4384_v29  ;;  %v6410_v55 = vadd.f32 %v10496_v35, %v4386_v30  ;;  %v11841_v9 = vadd.f32 %v6438_v21, %v6406_v27  ;;  %v6412_v45 = vadd.f32 %v10496_v35, %v4388_v42  ;;  %v6422_v27 = vld [vmem:[%s11813_s15 + $0x38] sm:$0xff]  ;;  %v6415_v21 = vld [vmem:[%s11813_s15] sm:$0xff] }
 0x1f6   : > { %v6414_v14 = vadd.f32 %v10496_v35, %v4390_v53  ;;  %v6407_v4 = vadd.f32 %v6373_v56, %v4383_v0  ;;  %v6409_v15 = vadd.f32 %v6373_v56, %v4385_v10  ;;  %v11850_v5 = vadd.f32 %v6437_v63, %v6405_v22  ;;  %v6426_v35 = vld [vmem:[%s11813_s15 + $0x58] sm:$0xff]  ;;  %v6421_v22 = vld [vmem:[%s11813_s15 + $0x30] sm:$0xff] }
 0x1f7   : > { %v11843_v11 = vadd.f32 %v6440_v41, %v6408_v54  ;;  %v11845_v2 = vadd.f32 %v6442_v18, %v6410_v55  ;;  %v11854_v26 = vadd.f32 %v6444_v43, %v6412_v45  ;;  %v6411_v28 = vadd.f32 %v6373_v56, %v4387_v7  ;;  %v6417_v41 = vld [vmem:[%s11813_s15 + $0x10] sm:$0xff]  ;;  %v6419_v18 = vld [vmem:[%s11813_s15 + $0x20] sm:$0xff] }
 0x1f8   : > { %v6413_v29 = vadd.f32 %v6373_v56, %v4389_v8  ;;  %v11856_v30 = vadd.f32 %v6446_v17, %v6414_v14  ;;  %v11858_v32 = vadd.f32 %v6439_v12, %v6407_v4  ;;  %v11860_v33 = vadd.f32 %v6441_v13, %v6409_v15  ;;  %v6423_v54 = vld [vmem:[%s11813_s15 + $0x40] sm:$0xff]  ;;  %v6425_v10 = vld [vmem:[%s11813_s15 + $0x50] sm:$0xff] }
 0x1f9   : > { %v11862_v58 = vadd.f32 %v6443_v23, %v6411_v28  ;;  %v6448_v42 = vadd.f32 %v6416_v59, %v11747_v38  ;;  %v6450_v53 = vadd.f32 %v6418_v60, %v11749_v20  ;;  %v6452_v55 = vadd.f32 %v6420_v34, %v11751_v39  ;;  %v6428_v23 = vld [vmem:[%s11813_s15 + $0x68] sm:$0xff]  ;;  %v6427_v28 = vld [vmem:[%s11813_s15 + $0x60] sm:$0xff]  ;;  %v6434_v59 = vld [vmem:[%s11813_s15 + $0x98] sm:$0xff] }
 0x1fa   : > { %v11864_v31 = vadd.f32 %v6445_v24, %v6413_v29  ;;  %v6454_v56 = vadd.f32 %v6422_v27, %v11753_v40  ;;  %v6456_v63 = vadd.f32 %v6424_v16, %v11758_v46  ;;  %v6458_v0 = vadd.f32 %v6426_v35, %v11760_v44  ;;  %v6430_v24 = vld [vmem:[%s11813_s15 + $0x78] sm:$0xff]  ;;  %v6432_v29 = vld [vmem:[%s11813_s15 + $0x88] sm:$0xff]  ;;  %v6429_v60 = vld [vmem:[%s11813_s15 + $0x70] sm:$0xff] }
 0x1fb   : > { %v6447_v38 = vadd.f32 %v6415_v21, %v11762_v47  ;;  %v6449_v20 = vadd.f32 %v6417_v41, %v11764_v48  ;;  %v6451_v39 = vadd.f32 %v6419_v18, %v11766_v49  ;;  %v6453_v40 = vadd.f32 %v6421_v22, %v11768_v50  ;;  %v6436_v34 = vld [vmem:[%s11813_s15 + $0xa8] sm:$0xff]  ;;  %v6431_v27 = vld [vmem:[%s11813_s15 + $0x80] sm:$0xff]  ;;  %v6433_v21 = vld [vmem:[%s11813_s15 + $0x90] sm:$0xff] }
 0x1fc   : > { %v6455_v45 = vadd.f32 %v6423_v54, %v11770_v51  ;;  %v6457_v48 = vadd.f32 %v6425_v10, %v11772_v52  ;;  %v6460_v16 = vadd.f32 %v6428_v23, %v11778_v57  ;;  %v6462_v35 = vadd.f32 %v6430_v24, %v11780_v61  ;;  %v6435_v41 = vld [vmem:[%s11813_s15 + $0xa0] sm:$0xff] }
 0x1fd   : > { %v6464_v22 = vadd.f32 %v6432_v29, %v11818_v1  ;;  %v6461_v54 = vadd.f32 %v6429_v60, %v11784_v62  ;;  %v6468_v57 = vadd.f32 %v6436_v34, %v11822_v3 }
 0x21e   : > { %v10526_v7 = vpop.f32.mrb[12].mxu0  ;;  %v10556_v17 = vpop.f32.mrb[12].mxu1 }
 0x21f   : > { %v9458_v46 = vadd.f32 %v10526_v7, %v6448_v42  ;;  %v9460_v44 = vadd.f32 %v10526_v7, %v6450_v53  ;;  %v9462_v8 = vadd.f32 %v10526_v7, %v6452_v55  ;;  %v6987_v43 = vpop.f32.mrb[13].mxu0  ;;  %v9464_v49 = vadd.f32 %v10556_v17, %v6454_v56  ;;  %v7479_v14 = vpop.f32.mrb[13].mxu1 }
 0x220   : > { %v9457_v12 = vadd.f32 %v6987_v43, %v6447_v38  ;;  %v9459_v13 = vadd.f32 %v6987_v43, %v6449_v20  ;;  %v9461_v47 = vadd.f32 %v6987_v43, %v6451_v39  ;;  %v9466_v50 = vadd.f32 %v10556_v17, %v6456_v63 }
 0x221   : > { %9490 = vst.msk [vmem:[%s11888_s18 + $0x8] sm:$0xff] %vm4407_vm14, %v9458_v46  ;;  %9492 = vst.msk [vmem:[%s11888_s18 + $0x18] sm:$0xff] %vm4407_vm14, %v9460_v44  ;;  %v9468_v51 = vadd.f32 %v10556_v17, %v6458_v0  ;;  %v9463_v52 = vadd.f32 %v7479_v14, %v6453_v40  ;;  %v9465_v4 = vadd.f32 %v7479_v14, %v6455_v45 }
 0x222   : > { %9494 = vst.msk [vmem:[%s11888_s18 + $0x28] sm:$0xff] %vm4407_vm14, %v9462_v8  ;;  %9489 = vst.msk [vmem:[%s11888_s18] sm:$0xff] %vm4407_vm14, %v9457_v12  ;;  %v9467_v15 = vadd.f32 %v7479_v14, %v6457_v48  ;;  %v6466_v42 = vadd.f32 %v6434_v59, %v11820_v25  ;;  %v6459_v53 = vadd.f32 %v6427_v28, %v11782_v6 }
 0x223   : > { %9491 = vst.msk [vmem:[%s11888_s18 + $0x10] sm:$0xff] %vm4407_vm14, %v9459_v13  ;;  %9493 = vst.msk [vmem:[%s11888_s18 + $0x20] sm:$0xff] %vm4407_vm14, %v9461_v47  ;;  %v6463_v63 = vadd.f32 %v6431_v27, %v11824_v19  ;;  %v6465_v25 = vadd.f32 %v6433_v21, %v11826_v36  ;;  %v6467_v6 = vadd.f32 %v6435_v41, %v11828_v37 }
 0x224   : > { %9496 = vst.msk [vmem:[%s11888_s18 + $0x38] sm:$0xff] %vm4407_vm14, %v9464_v49  ;;  %9498 = vst.msk [vmem:[%s11888_s18 + $0x48] sm:$0xff] %vm4407_vm14, %v9466_v50 }
 0x225   : > { %9500 = vst.msk [vmem:[%s11888_s18 + $0x58] sm:$0xff] %vm4407_vm14, %v9468_v51  ;;  %9495 = vst.msk [vmem:[%s11888_s18 + $0x30] sm:$0xff] %vm4407_vm14, %v9463_v52 }
 0x226   : > { %9497 = vst.msk [vmem:[%s11888_s18 + $0x40] sm:$0xff] %vm4407_vm14, %v9465_v4  ;;  %9499 = vst.msk [vmem:[%s11888_s18 + $0x50] sm:$0xff] %vm4407_vm14, %v9467_v15 }
 0x24a   : > { %v10586_v18 = vpop.f32.mrb[14].mxu0  ;;  %v10616_v0 = vpop.f32.mrb[14].mxu1 }
 0x24b   : > { %v9470_v55 = vadd.f32 %v10586_v18, %v6460_v16  ;;  %v9472_v56 = vadd.f32 %v10586_v18, %v6462_v35  ;;  %v7971_v61 = vpop.f32.mrb[15].mxu0  ;;  %v9474_v62 = vadd.f32 %v10616_v0, %v6464_v22  ;;  %v9476_v3 = vadd.f32 %v10616_v0, %v6466_v42  ;;  %v8463_v7 = vpop.f32.mrb[15].mxu1 }
 0x24c   : > { %v9469_v10 = vadd.f32 %v7971_v61, %v6459_v53  ;;  %v9471_v1 = vadd.f32 %v7971_v61, %v6461_v54  ;;  %v9478_v19 = vadd.f32 %v10616_v0, %v6468_v57  ;;  %v9473_v38 = vadd.f32 %v8463_v7, %v6463_v63 }
 0x24d   : > { %9502 = vst.msk [vmem:[%s11888_s18 + $0x68] sm:$0xff] %vm4407_vm14, %v9470_v55  ;;  %9504 = vst.msk [vmem:[%s11888_s18 + $0x78] sm:$0xff] %vm4407_vm14, %v9472_v56  ;;  %v9475_v20 = vadd.f32 %v8463_v7, %v6465_v25  ;;  %v9477_v36 = vadd.f32 %v8463_v7, %v6467_v6 }
 0x24e   : > { %9501 = vst.msk [vmem:[%s11888_s18 + $0x60] sm:$0xff] %vm4407_vm14, %v9469_v10  ;;  %9503 = vst.msk [vmem:[%s11888_s18 + $0x70] sm:$0xff] %vm4407_vm14, %v9471_v1 }
 0x24f   : > { %9506 = vst.msk [vmem:[%s11888_s18 + $0x88] sm:$0xff] %vm4407_vm14, %v9474_v62  ;;  %9508 = vst.msk [vmem:[%s11888_s18 + $0x98] sm:$0xff] %vm4407_vm14, %v9476_v3 }
 0x250   : > { %9510 = vst.msk [vmem:[%s11888_s18 + $0xa8] sm:$0xff] %vm4407_vm14, %v9478_v19  ;;  %9505 = vst.msk [vmem:[%s11888_s18 + $0x80] sm:$0xff] %vm4407_vm14, %v9473_v38 }
 0x251   : > { %9507 = vst.msk [vmem:[%s11888_s18 + $0x90] sm:$0xff] %vm4407_vm14, %v9475_v20  ;;  %9509 = vst.msk [vmem:[%s11888_s18 + $0xa0] sm:$0xff] %vm4407_vm14, %v9477_v36 }
 0x276   : > { %v10646_v37 = vpop.f32.mrb[16].mxu0  ;;  %v10676_v8 = vpop.f32.mrb[16].mxu1 }
 0x277   : > { %v9480_v39 = vadd.f32 %v10646_v37, %v11841_v9  ;;  %v9482_v40 = vadd.f32 %v10646_v37, %v11843_v11  ;;  %v9484_v46 = vadd.f32 %v10646_v37, %v11845_v2  ;;  %v8955_v44 = vpop.f32.mrb[17].mxu0  ;;  %v9486_v9 = vadd.f32 %v10676_v8, %v11854_v26  ;;  %v9447_v2 = vpop.f32.mrb[17].mxu1 }
 0x278   : > { %v9479_v43 = vadd.f32 %v8955_v44, %v11850_v5  ;;  %v9481_v45 = vadd.f32 %v8955_v44, %v11858_v32  ;;  %v9483_v17 = vadd.f32 %v8955_v44, %v11860_v33  ;;  %v9488_v11 = vadd.f32 %v10676_v8, %v11856_v30 }
 0x279   : > { %9512 = vst.msk [vmem:[%s11888_s18 + $0xb8] sm:$0xff] %vm4407_vm14, %v9480_v39  ;;  %9514 = vst.msk [vmem:[%s11888_s18 + $0xc8] sm:$0xff] %vm4407_vm14, %v9482_v40  ;;  %v9485_v5 = vadd.f32 %v9447_v2, %v11862_v58  ;;  %v9487_v32 = vadd.f32 %v9447_v2, %v11864_v31 }
 0x27a   : > { %9516 = vst.msk [vmem:[%s11888_s18 + $0xd8] sm:$0xff] %vm4407_vm14, %v9484_v46  ;;  %9511 = vst.msk [vmem:[%s11888_s18 + $0xb0] sm:$0xff] %vm4407_vm14, %v9479_v43 }
 0x27b   : > { %9513 = vst.msk [vmem:[%s11888_s18 + $0xc0] sm:$0xff] %vm4407_vm14, %v9481_v45  ;;  %9515 = vst.msk [vmem:[%s11888_s18 + $0xd0] sm:$0xff] %vm4407_vm14, %v9483_v17 }
 0x27c   : > { %9518 = vst.msk [vmem:[%s11888_s18 + $0xe8] sm:$0xff] %vm4407_vm14, %v9486_v9  ;;  %9520 = vst.msk [vmem:[%s11888_s18 + $0xf8] sm:$0xff] %vm4407_vm14, %v9488_v11 }
 0x27d   : > { %9517 = vst.msk [vmem:[%s11888_s18 + $0xe0] sm:$0xff] %vm4407_vm14, %v9485_v5  ;;  %9519 = vst.msk [vmem:[%s11888_s18 + $0xf0] sm:$0xff] %vm4407_vm14, %v9487_v32 }
 0x27e PF: > { %s15_s20 = sadd.s32 1, %s10905_s20   ;;  %s12025_s18 = smov %s10901_s19 }
 0x27f   : > { %p12_p5 = scmp.ge.s32.totalorder %s15_s20, 4   ;;  %s12026_s19 = smov %s12028_s21 }
 0x281   :  { %14 = sbr.rel (!%p12_p5) target bundleno = 2 (0x2), region = 82 }

</bundles_post_ra>
